<compile_context>
chip_gen: v7x
topology: tpu7x:2x2x1
jax: 0.10.0
libtpu: 0.0.40
codegen_flags: <defaults>
</compile_context>

<pallas_src>
from functools import partial

import jax
import jax.numpy as jnp
from jax.experimental import pallas as pl
from jax.experimental.pallas import tpu as pltpu


# ----------------------------- Pallas kernel -----------------------------

def _dwconv3x3_kernel(x_ref, w_ref, b_ref, o_ref, *, H, W, C):
    # x_ref: (B, Hpp, (W+2)*C)  zero-padded image; rows padded to a multiple of 8
    #                           sublanes; (W+2, C) flattened into one lane axis.
    # w_ref: (9, 1, (W+2)*C)    per-tap depthwise weights, pre-tiled along W.
    # b_ref: (1, 1, W*C)        bias, pre-tiled along W.
    # o_ref: (B, H, W*C)        lane-dense output slab.
    x = x_ref[...]
    Hpp = x.shape[1]
    Lp = x.shape[2]

    # Hoist the 9 per-tap weight rows out of the accumulation loop.
    ws = [w_ref[k] for k in range(9)]                      # each (1, Lp)

    # Row shifts (ki) as sublane rolls (XLU), computed once, reused for all kj.
    # pltpu.roll follows jnp.roll semantics: shift = Hpp - ki puts x[i+ki] at row i
    # (no wraparound inside the valid i < H region because of the zero padding).
    rows = (
        x,
        pltpu.roll(x, shift=Hpp - 1, axis=1),
        pltpu.roll(x, shift=Hpp - 2, axis=1),
    )

    # Accumulate over the padded extent; init from tap (0, 0) (no zeros vreg).
    acc = rows[0] * ws[0]
    for ki in range(3):
        for kj in range(3):
            if ki == 0 and kj == 0:
                continue
            tap = rows[ki]
            if kj:
                # Column shift (kj) = lane roll by kj*C on the flattened (W, C) axis.
                tap = pltpu.roll(tap, shift=Lp - kj * C, axis=2)
            acc = acc + tap * ws[3 * ki + kj]

    # Single lane-dense store of the valid window (W*C lanes), bias fused in.
    o_ref[...] = acc[:, :H, :W * C] + b_ref[...]


# ----------------------------- wrapper -----------------------------

def _dwconv(x, w, b, *, H, W):
    """Depthwise 3x3 conv on token maps.

    x: (B, N, C) with N == H*W, w: (3, 3, C) taps (w[ki, kj, c] == torch
    weight[c, 0, ki, kj]), b: (C,). Returns (B, N, C) in float32.
    """
    B, N, C = x.shape
    assert N == H * W, "N must equal H*W"
    Hp, Wp = H + 2, W + 2                 # conv zero padding of 1 per side
    pad_h = (-Hp) % 8                     # align the row (sublane) axis to 8
    Hpp = Hp + pad_h
    Lp = Wp * C                           # flattened lane axis: columns x channels
    Lo = W * C                            # output lane width (1024 in the demo)

    x_img = x.reshape(B, H, W, C).astype(jnp.float32)
    xp = jnp.pad(x_img, ((0, 0), (1, 1 + pad_h), (1, 1), (0, 0)))
    xf = xp.reshape(B, Hpp, Lp)

    # Hoisted per-tap weight / bias broadcasts: tiled along W once, outside the
    # kernel (JAX does not CSE broadcast_in_dim inside the tap loop).
    wf = jnp.tile(w.astype(jnp.float32).reshape(9, 1, C), (1, Wp, 1)).reshape(9, 1, Lp)
    bf = jnp.tile(b.astype(jnp.float32).reshape(1, C), (W, 1)).reshape(1, 1, Lo)

    out = pl.pallas_call(
        partial(_dwconv3x3_kernel, H=H, W=W, C=C),
        out_shape=jax.ShapeDtypeStruct((B, H, Lo), jnp.float32),
        in_specs=[
            pl.BlockSpec((B, Hpp, Lp), lambda: (0, 0, 0)),
            pl.BlockSpec((9, 1, Lp), lambda: (0, 0, 0)),
            pl.BlockSpec((1, 1, Lo), lambda: (0, 0, 0)),
        ],
        out_specs=pl.BlockSpec((B, H, Lo), lambda: (0, 0, 0)),
    )(xf, wf, bf)

    # (B, H, W*C) -> (B, N, C): contiguous reshape, free.
    return out.reshape(B, N, C)


dwconv = jax.jit(_dwconv, static_argnames=("H", "W"))


# ----------------------------- pure-JAX reference -----------------------------

def dwconv_ref(x, w, b, H, W):
    """nn.Conv2d(C, C, 3, stride=1, padding=1, groups=C, bias=True) on (B,N,C)."""
    B, N, C = x.shape
    img = x.reshape(B, H, W, C)
    kern = w.reshape(3, 3, 1, C)          # HWIO with I=1 (depthwise)
    out = jax.lax.conv_general_dilated(
        img, kern, window_strides=(1, 1), padding=((1, 1), (1, 1)),
        dimension_numbers=("NHWC", "HWIO", "NHWC"), feature_group_count=C)
    return (out + b).reshape(B, N, C)


# ----------------------------- main -----------------------------

if __name__ == "__main__":
    key = jax.random.PRNGKey(0)
    kx, kw, kb = jax.random.split(key, 3)

    # Small shapes consistent with the module's use inside the SegFormer MLP:
    # dim=64 channels, 16x16 token map, batch 2  ->  x: (2, 256, 64).
    B, H, W, C = 2, 16, 16, 64
    N = H * W
    x = jax.random.normal(kx, (B, N, C), jnp.float32)
    w = 0.2 * jax.random.normal(kw, (3, 3, C), jnp.float32)   # w[ki, kj, c]
    b = 0.1 * jax.random.normal(kb, (C,), jnp.float32)

    out = jax.block_until_ready(dwconv(x, w, b, H=H, W=W))
    ref = jax.block_until_ready(dwconv_ref(x, w, b, H, W))

    assert out.shape == (B, N, C), out.shape
    assert bool(jnp.all(jnp.isfinite(out)))
    assert bool(jnp.allclose(out, ref, atol=1e-4, rtol=1e-4)), float(
        jnp.max(jnp.abs(out - ref)))
    print("KERNEL_OK")
</pallas_src>

<mosaic_0001>
module attributes {stable_mosaic.version = 11 : i64} {
  func.func @_dwconv3x3_kernel(%arg0: memref<2x24x1152xf32, #tpu.memory_space<vmem>>, %arg1: memref<9x1x1152xf32, #tpu.memory_space<vmem>>, %arg2: memref<1x1x1024xf32, #tpu.memory_space<vmem>>, %arg3: memref<2x16x1024xf32, #tpu.memory_space<vmem>>) attributes {dimension_semantics = [], scalar_prefetch = 0 : i64, scratch_operands = 0 : i64, tpu.core_type = #tpu.core_type<tc>} {
    %c0 = arith.constant 0 : index
    %c0_0 = arith.constant 0 : index
    %c0_1 = arith.constant 0 : index
    %0 = vector.load %arg0[%c0, %c0_0, %c0_1] : memref<2x24x1152xf32, #tpu.memory_space<vmem>>, vector<2x24x1152xf32>
    %c0_2 = arith.constant 0 : index
    %c0_3 = arith.constant 0 : index
    %c0_4 = arith.constant 0 : index
    %1 = vector.load %arg1[%c0_2, %c0_3, %c0_4] : memref<9x1x1152xf32, #tpu.memory_space<vmem>>, vector<1x1x1152xf32>
    %2 = vector.shape_cast %1 : vector<1x1x1152xf32> to vector<1x1152xf32>
    %c1 = arith.constant 1 : index
    %c0_5 = arith.constant 0 : index
    %c0_6 = arith.constant 0 : index
    %3 = vector.load %arg1[%c1, %c0_5, %c0_6] : memref<9x1x1152xf32, #tpu.memory_space<vmem>>, vector<1x1x1152xf32>
    %4 = vector.shape_cast %3 : vector<1x1x1152xf32> to vector<1x1152xf32>
    %c2 = arith.constant 2 : index
    %c0_7 = arith.constant 0 : index
    %c0_8 = arith.constant 0 : index
    %5 = vector.load %arg1[%c2, %c0_7, %c0_8] : memref<9x1x1152xf32, #tpu.memory_space<vmem>>, vector<1x1x1152xf32>
    %6 = vector.shape_cast %5 : vector<1x1x1152xf32> to vector<1x1152xf32>
    %c3 = arith.constant 3 : index
    %c0_9 = arith.constant 0 : index
    %c0_10 = arith.constant 0 : index
    %7 = vector.load %arg1[%c3, %c0_9, %c0_10] : memref<9x1x1152xf32, #tpu.memory_space<vmem>>, vector<1x1x1152xf32>
    %8 = vector.shape_cast %7 : vector<1x1x1152xf32> to vector<1x1152xf32>
    %c4 = arith.constant 4 : index
    %c0_11 = arith.constant 0 : index
    %c0_12 = arith.constant 0 : index
    %9 = vector.load %arg1[%c4, %c0_11, %c0_12] : memref<9x1x1152xf32, #tpu.memory_space<vmem>>, vector<1x1x1152xf32>
    %10 = vector.shape_cast %9 : vector<1x1x1152xf32> to vector<1x1152xf32>
    %c5 = arith.constant 5 : index
    %c0_13 = arith.constant 0 : index
    %c0_14 = arith.constant 0 : index
    %11 = vector.load %arg1[%c5, %c0_13, %c0_14] : memref<9x1x1152xf32, #tpu.memory_space<vmem>>, vector<1x1x1152xf32>
    %12 = vector.shape_cast %11 : vector<1x1x1152xf32> to vector<1x1152xf32>
    %c6 = arith.constant 6 : index
    %c0_15 = arith.constant 0 : index
    %c0_16 = arith.constant 0 : index
    %13 = vector.load %arg1[%c6, %c0_15, %c0_16] : memref<9x1x1152xf32, #tpu.memory_space<vmem>>, vector<1x1x1152xf32>
    %14 = vector.shape_cast %13 : vector<1x1x1152xf32> to vector<1x1152xf32>
    %c7 = arith.constant 7 : index
    %c0_17 = arith.constant 0 : index
    %c0_18 = arith.constant 0 : index
    %15 = vector.load %arg1[%c7, %c0_17, %c0_18] : memref<9x1x1152xf32, #tpu.memory_space<vmem>>, vector<1x1x1152xf32>
    %16 = vector.shape_cast %15 : vector<1x1x1152xf32> to vector<1x1152xf32>
    %c8 = arith.constant 8 : index
    %c0_19 = arith.constant 0 : index
    %c0_20 = arith.constant 0 : index
    %17 = vector.load %arg1[%c8, %c0_19, %c0_20] : memref<9x1x1152xf32, #tpu.memory_space<vmem>>, vector<1x1x1152xf32>
    %18 = vector.shape_cast %17 : vector<1x1x1152xf32> to vector<1x1152xf32>
    %c23_i32 = arith.constant 23 : i32
    %19 = tpu.dynamic_rotate %0 by %c23_i32 dim 1 : vector<2x24x1152xf32>, i32 -> vector<2x24x1152xf32>
    %c22_i32 = arith.constant 22 : i32
    %20 = tpu.dynamic_rotate %0 by %c22_i32 dim 1 : vector<2x24x1152xf32>, i32 -> vector<2x24x1152xf32>
    %21 = vector.shape_cast %2 : vector<1x1152xf32> to vector<1x1x1152xf32>
    %22 = vector.broadcast %21 : vector<1x1x1152xf32> to vector<2x24x1152xf32>
    %23 = arith.mulf %0, %22 : vector<2x24x1152xf32>
    %c1088_i32 = arith.constant 1088 : i32
    %24 = tpu.dynamic_rotate %0 by %c1088_i32 dim 2 : vector<2x24x1152xf32>, i32 -> vector<2x24x1152xf32>
    %25 = vector.shape_cast %4 : vector<1x1152xf32> to vector<1x1x1152xf32>
    %26 = vector.broadcast %25 : vector<1x1x1152xf32> to vector<2x24x1152xf32>
    %27 = arith.mulf %24, %26 : vector<2x24x1152xf32>
    %28 = arith.addf %23, %27 : vector<2x24x1152xf32>
    %c1024_i32 = arith.constant 1024 : i32
    %29 = tpu.dynamic_rotate %0 by %c1024_i32 dim 2 : vector<2x24x1152xf32>, i32 -> vector<2x24x1152xf32>
    %30 = vector.shape_cast %6 : vector<1x1152xf32> to vector<1x1x1152xf32>
    %31 = vector.broadcast %30 : vector<1x1x1152xf32> to vector<2x24x1152xf32>
    %32 = arith.mulf %29, %31 : vector<2x24x1152xf32>
    %33 = arith.addf %28, %32 : vector<2x24x1152xf32>
    %34 = vector.shape_cast %8 : vector<1x1152xf32> to vector<1x1x1152xf32>
    %35 = vector.broadcast %34 : vector<1x1x1152xf32> to vector<2x24x1152xf32>
    %36 = arith.mulf %19, %35 : vector<2x24x1152xf32>
    %37 = arith.addf %33, %36 : vector<2x24x1152xf32>
    %c1088_i32_21 = arith.constant 1088 : i32
    %38 = tpu.dynamic_rotate %19 by %c1088_i32_21 dim 2 : vector<2x24x1152xf32>, i32 -> vector<2x24x1152xf32>
    %39 = vector.shape_cast %10 : vector<1x1152xf32> to vector<1x1x1152xf32>
    %40 = vector.broadcast %39 : vector<1x1x1152xf32> to vector<2x24x1152xf32>
    %41 = arith.mulf %38, %40 : vector<2x24x1152xf32>
    %42 = arith.addf %37, %41 : vector<2x24x1152xf32>
    %c1024_i32_22 = arith.constant 1024 : i32
    %43 = tpu.dynamic_rotate %19 by %c1024_i32_22 dim 2 : vector<2x24x1152xf32>, i32 -> vector<2x24x1152xf32>
    %44 = vector.shape_cast %12 : vector<1x1152xf32> to vector<1x1x1152xf32>
    %45 = vector.broadcast %44 : vector<1x1x1152xf32> to vector<2x24x1152xf32>
    %46 = arith.mulf %43, %45 : vector<2x24x1152xf32>
    %47 = arith.addf %42, %46 : vector<2x24x1152xf32>
    %48 = vector.shape_cast %14 : vector<1x1152xf32> to vector<1x1x1152xf32>
    %49 = vector.broadcast %48 : vector<1x1x1152xf32> to vector<2x24x1152xf32>
    %50 = arith.mulf %20, %49 : vector<2x24x1152xf32>
    %51 = arith.addf %47, %50 : vector<2x24x1152xf32>
    %c1088_i32_23 = arith.constant 1088 : i32
    %52 = tpu.dynamic_rotate %20 by %c1088_i32_23 dim 2 : vector<2x24x1152xf32>, i32 -> vector<2x24x1152xf32>
    %53 = vector.shape_cast %16 : vector<1x1152xf32> to vector<1x1x1152xf32>
    %54 = vector.broadcast %53 : vector<1x1x1152xf32> to vector<2x24x1152xf32>
    %55 = arith.mulf %52, %54 : vector<2x24x1152xf32>
    %56 = arith.addf %51, %55 : vector<2x24x1152xf32>
    %c1024_i32_24 = arith.constant 1024 : i32
    %57 = tpu.dynamic_rotate %20 by %c1024_i32_24 dim 2 : vector<2x24x1152xf32>, i32 -> vector<2x24x1152xf32>
    %58 = vector.shape_cast %18 : vector<1x1152xf32> to vector<1x1x1152xf32>
    %59 = vector.broadcast %58 : vector<1x1x1152xf32> to vector<2x24x1152xf32>
    %60 = arith.mulf %57, %59 : vector<2x24x1152xf32>
    %61 = arith.addf %56, %60 : vector<2x24x1152xf32>
    %62 = vector.extract_strided_slice %61 {offsets = [0, 0, 0], sizes = [2, 16, 1024], strides = [1, 1, 1]} : vector<2x24x1152xf32> to vector<2x16x1024xf32>
    %c0_25 = arith.constant 0 : index
    %c0_26 = arith.constant 0 : index
    %c0_27 = arith.constant 0 : index
    %63 = vector.load %arg2[%c0_25, %c0_26, %c0_27] : memref<1x1x1024xf32, #tpu.memory_space<vmem>>, vector<1x1x1024xf32>
    %64 = vector.broadcast %63 : vector<1x1x1024xf32> to vector<2x16x1024xf32>
    %65 = arith.addf %62, %64 : vector<2x16x1024xf32>
    %c0_28 = arith.constant 0 : index
    %c0_29 = arith.constant 0 : index
    %c0_30 = arith.constant 0 : index
    %66 = vector.load %arg3[%c0_28, %c0_29, %c0_30] : memref<2x16x1024xf32, #tpu.memory_space<vmem>>, vector<2x16x1024xf32>
    tpu.vector_store %arg3[%c0_28, %c0_29, %c0_30], %65 {strides = array<i32>} : memref<2x16x1024xf32, #tpu.memory_space<vmem>>, vector<2x16x1024xf32>,
    return
  }
}

</mosaic_0001>

<bundles_post_ra>
// kernel: tile.14
= control target key start
LH: loop header
LB: loop body
LE: loop exit
PB: predicated region body
PF: predicated region fallthrough
CT: control target
= control target key end

     0   :  { %s28_s0 = inlined_call_operand.vmem [shape: f32[64], index: 0, kind: input, shape index: {}]   ;;  %s29_s1 = inlined_call_operand.vmem [shape: f32[16,1,1,64], index: 1, kind: output, shape index: {}]  }
   0x1   :  { %v4_v0 = vld [vmem:[%s28_s0] ss:$0 sm:$0xff] }
   0x2   :  { %5 = vst [vmem:[%s29_s1] sm:$0xff] %v4_v0  ;;  %8 = vst [vmem:[%s29_s1 + $0x8] sm:$0xff] %v4_v0 }

// kernel: tile.15
= control target key start
LH: loop header
LB: loop body
LE: loop exit
PB: predicated region body
PF: predicated region fallthrough
CT: control target
= control target key end

     0   :  { %vm3_vm0 = vcmask 523264   ;;  %vm10_vm1 = vcmask 1048064   ;;  %s116_s0 = inlined_call_operand.vmem [shape: f32[16,1,1,64], index: 0, kind: input, shape index: {}]   ;;  %s117_s1 = inlined_call_operand.vmem [shape: f32[1,1,1024], index: 1, kind: output, shape index: {}]  }
   0x1   :  { %v66_v0 = vld [vmem:[%s116_s0 + $0x1] ss:$2 sm:$0xff]   ;;  %v2_v1 = vld [vmem:[%s116_s0] ss:$2 sm:$0xff]   ;;  %s75_s0 = smov 64  }
   0x2   :  { %8 = vrot.lane.b32.xlu0 %v66_v0, %s75_s0  ;;  %4 = vst.msk [vmem:[#allocation0] ss:$8 sm:$0xf] %vm3_vm0, %v2_v1   ;;  %5 = vst.msk [vmem:[#allocation0] ss:$8 sm:$0xf0] %vm3_vm0, %v2_v1  }
  0x74   :  { %v9_v2 = vpop.permute.xlu0 %8  }
  0x75   :  { %11 = vst.msk [vmem:[#allocation0] ss:$8 sm:$0xf] %vm10_vm1, %v9_v2   ;;  %12 = vst.msk [vmem:[#allocation0] ss:$8 sm:$0xf0] %vm10_vm1, %v9_v2  }
  0x7c   :  { %v16_v3 = vld [vmem:[#allocation0] sm:$0x1]  ;;  %v20_v4 = vld [vmem:[#allocation0 + $0x8] sm:$0x1]  ;;  %v25_v5 = vld [vmem:[#allocation0 + $0x10] sm:$0x1] }
  0x7d   :  { %18 = vst [vmem:[%s117_s1] sm:$0x1] %v16_v3  ;;  %67 = vst [vmem:[%s117_s1 + $0x1] sm:$0x1] %v20_v4  ;;  %v31_v6 = vld [vmem:[#allocation0 + $0x18] sm:$0x1] }
  0x7e   :  { %68 = vst [vmem:[%s117_s1 + $0x2] sm:$0x1] %v25_v5  ;;  %v37_v7 = vld [vmem:[#allocation0 + $0x20] sm:$0x1]  ;;  %v43_v8 = vld [vmem:[#allocation0 + $0x28] sm:$0x1] }
  0x7f   :  { %69 = vst [vmem:[%s117_s1 + $0x3] sm:$0x1] %v31_v6  ;;  %70 = vst [vmem:[%s117_s1 + $0x4] sm:$0x1] %v37_v7  ;;  %v49_v9 = vld [vmem:[#allocation0 + $0x30] sm:$0x1] }
  0x80   :  { %71 = vst [vmem:[%s117_s1 + $0x5] sm:$0x1] %v43_v8  ;;  %v55_v10 = vld [vmem:[#allocation0 + $0x38] sm:$0x1]  ;;  %72 = vst [vmem:[%s117_s1 + $0x6] sm:$0x1] %v49_v9 }
  0x81   :  { %73 = vst [vmem:[%s117_s1 + $0x7] sm:$0x1] %v55_v10 }

// kernel: _dwconv.1
= control target key start
LH: loop header
LB: loop body
LE: loop exit
PB: predicated region body
PF: predicated region fallthrough
CT: control target
= control target key end

     0   :  { %v3650_v0 = vlaneseq  ;;  %s1620_s16 = smov 64   ;;  %s3646_s0 = inlined_call_operand.vmem [shape: f32[2,24,1152], index: 0, kind: input, shape index: {}]   ;;  %s3647_s1 = inlined_call_operand.vmem [shape: f32[9,1,1152], index: 1, kind: input, shape index: {}]   ;;  %s3648_s2 = inlined_call_operand.vmem [shape: f32[1,1,1024], index: 2, kind: input, shape index: {}]   ;;  %s3649_s3 = inlined_call_operand.vmem [shape: f32[2,16,1024], index: 3, kind: output, shape index: {}]  }
   0x1   :  { %v1644_v1 = vld [vmem:[%s3646_s0 + $0xd8] sm:$0xff]  ;;  %v1649_v2 = vld [vmem:[%s3646_s0] sm:$0xff]  ;;  %v1666_v5 = vld [vmem:[%s3646_s0 + $0x48] sm:$0xff] }
   0x2   :  { %v1652_v3 = vshrl.u32 %v3650_v0, 7  ;;  %346 = vrot.lane.b32.xlu1 %v1644_v1, %s1620_s16  ;;  %342 = vrot.lane.b32.xlu0 %v1649_v2, %s1620_s16  ;;  %v1661_v4 = vld [vmem:[%s3646_s0 + $0x120] sm:$0xff]  ;;  %v85_v6 = vrot.slane %v1649_v2, 1  ;;  %v94_v7 = vrot.slane %v1644_v1, 1  ;;  %v103_v9 = vrot.slane %v1666_v5, 1  ;;  %v1683_v12 = vld [vmem:[%s3646_s0 + $0x50] sm:$0xff] }
   0x3   :  { %v1673_v8 = vld [vmem:[%s3647_s1] sm:$0xff]  ;;  %v112_v10 = vrot.slane %v1661_v4, 1  ;;  %v1689_v13 = vld [vmem:[%s3646_s0 + $0x8] sm:$0xff]  ;;  %v104_v17 = vrot.slane %v1683_v12, 1  ;;  %v1749_v30 = vld [vmem:[%s3646_s0 + $0x58] sm:$0xff] }
   0x4   :  { %3755 = vst [vmem:[#allocation2_spill] sm:$0xff] %v1652_v3  ;;  %v1678_v11 = vsub.s32 0, %v1652_v3  ;;  %vm141_vm0 = vcmp.lt.s32.totalorder %v1652_v3, 7  ;;  %v1694_v14 = vld [vmem:[%s3646_s0 + $0x128] sm:$0xff]  ;;  %v1714_v19 = vld [vmem:[%s3646_s0 + $0xe0] sm:$0xff]  ;;  %v86_v20 = vrot.slane %v1689_v13, 1 }
   0x5   :  { %v1698_v15 = vsel %vm141_vm0, %v85_v6, %v103_v9  ;;  %v1702_v16 = vsel %vm141_vm0, %v94_v7, %v112_v10  ;;  %v113_v21 = vrot.slane %v1694_v14, 1  ;;  %v95_v22 = vrot.slane %v1714_v19, 1  ;;  %v1754_v31 = vld [vmem:[%s3646_s0 + $0x10] sm:$0xff]  ;;  %v1759_v32 = vld [vmem:[%s3646_s0 + $0x88] sm:$0xff]  ;;  %v1769_v34 = vld [vmem:[%s3646_s0 + $0x40] sm:$0xff] }
   0x6   :  { %3756 = vst [vmem:[#allocation3_spill] sm:$0xff] %v1678_v11  ;;  %v273_v18 = vrot.slane %v1673_v8, %v1678_v11  ;;  %348 = vrot.lane.b32.xlu1 %v1661_v4, %s1620_s16  ;;  %344 = vrot.lane.b32.xlu0 %v1666_v5, %s1620_s16  ;;  %v1733_v27 = vsel %vm141_vm0, %v86_v20, %v104_v17  ;;  %v1744_v29 = vsub.s32 7, %v1652_v3  ;;  %v1764_v33 = vld [vmem:[%s3647_s1 + $0x12] sm:$0xff]  ;;  %v1780_v36 = vld [vmem:[%s3646_s0 + $0x160] sm:$0xff]  ;;  %v1803_v41 = vsub.s32 1, %v1652_v3 }
   0x7   :  { %v1737_v28 = vsel %vm141_vm0, %v95_v22, %v113_v21  ;;  %v1785_v37 = vld [vmem:[%s3646_s0 + $0x118] sm:$0xff]  ;;  %v1790_v38 = vld [vmem:[%s3646_s0 + $0x90] sm:$0xff]  ;;  %v1800_v40 = vld [vmem:[%s3646_s0 + $0x168] sm:$0xff]  ;;  %vm232_vm1 = vcmp.lt.s32.totalorder %v1652_v3, 6 }
   0x8   :  { %v1720_v23 = vmul.f32 %v273_v18, %v1644_v1  ;;  %v1723_v24 = vmul.f32 %v273_v18, %v1649_v2  ;;  %v1726_v25 = vmul.f32 %v273_v18, %v1661_v4  ;;  %v1729_v26 = vmul.f32 %v273_v18, %v1666_v5  ;;  %3761 = vst [vmem:[#allocation8_spill] sm:$0xff] %v1744_v29  ;;  %v1795_v39 = vld [vmem:[%s3647_s1 + $0x1b] sm:$0xff]  ;;  %v1611_v47 = vld [vmem:[%s3647_s1 + $0x2d] sm:$0xff] }
   0x9   :  { %v586_v35 = vrot.slane %v1764_v33, %v1744_v29  ;;  %3762 = vst [vmem:[#allocation9_spill] sm:$0xff] %v1795_v39  ;;  %3763 = vst [vmem:[#allocation10_spill] sm:$0xff] %v1803_v41  ;;  %v1820_v46 = vld [vmem:[%s3646_s0 + $0x98] sm:$0xff]  ;;  %v1828_v48 = vld [vmem:[%s3646_s0 + $0x170] sm:$0xff]  ;;  %v121_v49 = vrot.slane %v1790_v38, 1  ;;  %v663_v50 = vrot.slane %v1795_v39, %v1678_v11  ;;  %v130_v51 = vrot.slane %v1800_v40, 1 }
   0xa   :  { %3757 = vst [vmem:[#allocation4_spill] sm:$0xff] %v1720_v23  ;;  %3758 = vst [vmem:[#allocation5_spill] sm:$0xff] %v1723_v24  ;;  %352 = vrot.lane.b32.xlu1 %v1683_v12, %s1620_s16  ;;  %350 = vrot.lane.b32.xlu0 %v1689_v13, %s1620_s16  ;;  %v122_v52 = vrot.slane %v1820_v46, 1  ;;  %v667_v53 = vrot.slane %v1795_v39, %v1803_v41  ;;  %v977_v54 = vrot.slane %v1611_v47, %v1678_v11  ;;  %v1846_v56 = vld [vmem:[%s3646_s0 + $0x130] sm:$0xff]  ;;  %v1851_v57 = vld [vmem:[%s3646_s0 + $0xe8] sm:$0xff] }
   0xb   :  { %3759 = vst [vmem:[#allocation6_spill] sm:$0xff] %v1726_v25  ;;  %3760 = vst [vmem:[#allocation7_spill] sm:$0xff] %v1729_v26  ;;  %v1806_v42 = vmul.f32 %v586_v35, %v1759_v32  ;;  %v1809_v43 = vmul.f32 %v586_v35, %v1769_v34  ;;  %v1812_v44 = vmul.f32 %v586_v35, %v1780_v36  ;;  %v131_v55 = vrot.slane %v1828_v48, 1  ;;  %v1914_v47 = vld [vmem:[%s3646_s0 + $0x18] sm:$0xff]  ;;  %v1960_v0 = vld [vmem:[%s3646_s0 + $0xc0] sm:$0xff] }
   0xc   :  { %v1815_v45 = vmul.f32 %v586_v35, %v1785_v37  ;;  %v1855_v58 = vsel %vm141_vm0, %v103_v9, %v121_v49  ;;  %v1858_v59 = vmul.f32 %v663_v50, %v1698_v15  ;;  %v1862_v60 = vsel %vm141_vm0, %v112_v10, %v130_v51  ;;  %v1931_v51 = vld [vmem:[%s3646_s0 + $0xf0] sm:$0xff]  ;;  %v2043_v24 = vld [vmem:[%s3646_s0 + $0xc8] sm:$0xff] }
   0xd   :  { %3764 = vst [vmem:[#allocation11_spill] sm:$0xff] %v1806_v42  ;;  %3765 = vst [vmem:[#allocation12_spill] sm:$0xff] %v1809_v43  ;;  %v1865_v61 = vmul.f32 %v663_v50, %v1702_v16  ;;  %v1868_v62 = vmul.f32 %v663_v50, %v1855_v58  ;;  %v1871_v63 = vmul.f32 %v663_v50, %v1862_v60  ;;  %v1926_v50 = vld [vmem:[%s3646_s0 + $0x138] sm:$0xff]  ;;  %v2048_v26 = vld [vmem:[%s3646_s0 + $0x108] sm:$0xff] }
   0xe   :  { %356 = vrot.lane.b32.xlu1 %v1694_v14, %s1620_s16  ;;  %354 = vrot.lane.b32.xlu0 %v1714_v19, %s1620_s16  ;;  %3766 = vst [vmem:[#allocation13_spill] sm:$0xff] %v1812_v44  ;;  %3767 = vst [vmem:[#allocation14_spill] sm:$0xff] %v1815_v45  ;;  %v1875_v6 = vsel %vm141_vm0, %v104_v17, %v122_v52  ;;  %v1878_v7 = vmul.f32 %v667_v53, %v1733_v27  ;;  %v1940_v52 = vld [vmem:[%s3646_s0 + $0x68] sm:$0xff]  ;;  %v1985_v45 = vld [vmem:[%s3646_s0 + $0x78] sm:$0xff] }
   0xf   :  { %3768 = vst [vmem:[#allocation15_spill] sm:$0xff] %v1858_v59  ;;  %3769 = vst [vmem:[#allocation16_spill] sm:$0xff] %v1865_v61  ;;  %v1881_v9 = vmul.f32 %v667_v53, %v1875_v6  ;;  %v1884_v10 = vmul.f32 %v977_v54, %v1875_v6  ;;  %v1887_v18 = vmul.f32 %v977_v54, %v1733_v27  ;;  %v109_v42 = vrot.slane %v1985_v45, 1 }
  0x10   :  { %3770 = vst [vmem:[#allocation17_spill] sm:$0xff] %v1868_v62  ;;  %3771 = vst [vmem:[#allocation18_spill] sm:$0xff] %v1871_v63  ;;  %v1891_v20 = vsel %vm141_vm0, %v113_v21, %v131_v55  ;;  %v1904_v35 = vmul.f32 %v667_v53, %v1737_v28  ;;  %v1909_v21 = vld [vmem:[%s3646_s0 + $0x60] sm:$0xff]  ;;  %v1917_v49 = vmul.f32 %v977_v54, %v1737_v28  ;;  %v1955_v55 = vld [vmem:[%s3646_s0 + $0x148] sm:$0xff] }
  0x11   :  { %3772 = vst [vmem:[#allocation19_spill] sm:$0xff] %v1878_v7  ;;  %3773 = vst [vmem:[#allocation20_spill] sm:$0xff] %v1881_v9  ;;  %v1898_v17 = vmul.f32 %v667_v53, %v1891_v20  ;;  %v1901_v22 = vmul.f32 %v977_v54, %v1891_v20  ;;  %v1945_v53 = vld [vmem:[%s3646_s0 + $0x20] sm:$0xff]  ;;  %v1950_v54 = vld [vmem:[%s3646_s0 + $0x190] sm:$0xff]  ;;  %v558_v23 = vrot.slane %v1764_v33, %v1678_v11  ;;  %v100_v11 = vrot.slane %v2048_v26, 1 }
  0x12   :  { %360 = vrot.lane.b32.xlu1 %v1749_v30, %s1620_s16  ;;  %358 = vrot.lane.b32.xlu0 %v1754_v31, %s1620_s16  ;;  %3774 = vst [vmem:[#allocation21_spill] sm:$0xff] %v1884_v10  ;;  %3775 = vst [vmem:[#allocation22_spill] sm:$0xff] %v1887_v18  ;;  %v1975_v18 = vld [vmem:[%s3646_s0 + $0x140] sm:$0xff]  ;;  %v1980_v10 = vld [vmem:[%s3646_s0 + $0xf8] sm:$0xff]  ;;  %v135_v44 = vrot.slane %v1950_v54, 1 }
  0x13   :  { %3776 = vst [vmem:[#allocation23_spill] sm:$0xff] %v1898_v17  ;;  %3777 = vst [vmem:[#allocation24_spill] sm:$0xff] %v1901_v22  ;;  %v117_v22 = vrot.slane %v1955_v55, 1  ;;  %v1994_v17 = vld [vmem:[%s3646_s0 + $0x30] sm:$0xff]  ;;  %v2012_v63 = vld [vmem:[%s3646_s0 + $0x198] sm:$0xff]  ;;  %v2064_v39 = vmul.f32 %v558_v23, %v1689_v13 }
  0x14   :  { %3778 = vst [vmem:[#allocation25_spill] sm:$0xff] %v1904_v35  ;;  %3779 = vst [vmem:[#allocation26_spill] sm:$0xff] %v1917_v49  ;;  %v1969_v49 = vld [vmem:[%s3646_s0 + $0x100] sm:$0xff]  ;;  %v127_v35 = vrot.slane %v1960_v0, 1  ;;  %v91_v61 = vrot.slane %v1994_v17, 1 }
  0x15   :  { %v99_v43 = vrot.slane %v1969_v49, 1  ;;  %v1998_v7 = vsel %vm141_vm0, %v117_v22, %v135_v44  ;;  %v2017_v44 = vld [vmem:[%s3646_s0 + $0x70] sm:$0xff]  ;;  %3786 = vst [vmem:[#allocation33_spill] sm:$0xff] %v2043_v24  ;;  %3788 = vst [vmem:[#allocation35_spill] sm:$0xff] %v2064_v39  ;;  %v2086_v39 = vld [vmem:[%s3646_s0 + $0x1a0] sm:$0xff] }
  0x16   :  { %364 = vrot.lane.b32.xlu1 %v1846_v56, %s1620_s16  ;;  %362 = vrot.lane.b32.xlu0 %v1851_v57, %s1620_s16  ;;  %3780 = vst [vmem:[#allocation27_spill] sm:$0xff] %v1998_v7  ;;  %3782 = vst [vmem:[#allocation29_spill] sm:$0xff] %v2017_v44  ;;  %v2031_v59 = vsel %vm141_vm0, %v109_v42, %v127_v35  ;;  %v2035_v62 = vsel %vm141_vm0, %v91_v61, %v109_v42  ;;  %v136_v35 = vrot.slane %v2012_v63, 1  ;;  %v2058_v42 = vld [vmem:[%s3646_s0 + $0x80] sm:$0xff] }
  0x17   :  { %v2002_v9 = vsel %vm141_vm0, %v99_v43, %v117_v22  ;;  %v2022_v43 = vld [vmem:[%s3646_s0 + $0x28] sm:$0xff]  ;;  %v2027_v22 = vld [vmem:[%s3646_s0 + $0x150] sm:$0xff]  ;;  %3784 = vst [vmem:[#allocation31_spill] sm:$0xff] %v2031_v59  ;;  %3785 = vst [vmem:[#allocation32_spill] sm:$0xff] %v2035_v62  ;;  %v2061_v61 = vmul.f32 %v558_v23, %v1683_v12  ;;  %v2068_v62 = vmul.f32 %v558_v23, %v1694_v14  ;;  %v110_v7 = vrot.slane %v2058_v42, 1 }
  0x18   :  { %3781 = vst [vmem:[#allocation28_spill] sm:$0xff] %v2002_v9  ;;  %3783 = vst [vmem:[#allocation30_spill] sm:$0xff] %v2022_v43  ;;  %v118_v25 = vrot.slane %v2027_v22, 1  ;;  %v2075_v9 = vmul.f32 %v558_v23, %v1714_v19 }
  0x19   :  { %3787 = vst [vmem:[#allocation34_spill] sm:$0xff] %v2061_v61  ;;  %3789 = vst [vmem:[#allocation36_spill] sm:$0xff] %v2068_v62 }
  0x1a   :  { %368 = vrot.lane.b32.xlu1 %v1909_v21, %s1620_s16  ;;  %366 = vrot.lane.b32.xlu0 %v1914_v47, %s1620_s16  ;;  %v2072_v59 = vsel %vm141_vm0, %v118_v25, %v136_v35  ;;  %3791 = vst [vmem:[#allocation38_spill] sm:$0xff] %v2075_v9  ;;  %v2081_v61 = vsel %vm141_vm0, %v100_v11, %v118_v25  ;;  %3793 = vst [vmem:[#allocation40_spill] sm:$0xff] %v2086_v39  ;;  %v2091_v35 = vld [vmem:[%s3646_s0 + $0x38] sm:$0xff] }
  0x1b   :  { %3790 = vst [vmem:[#allocation37_spill] sm:$0xff] %v2072_v59  ;;  %3792 = vst [vmem:[#allocation39_spill] sm:$0xff] %v2081_v61  ;;  %v2104_v11 = vld [vmem:[%s3646_s0 + $0x158] sm:$0xff]  ;;  %v92_v25 = vrot.slane %v2091_v35, 1  ;;  %v277_v9 = vrot.slane %v1673_v8, %v1803_v41 }
  0x1c   :  { %v119_v62 = vrot.slane %v2104_v11, 1 }
  0x1d   :  { %v2118_v61 = vsel %vm141_vm0, %v92_v25, %v110_v7  ;;  %v2121_v59 = vmul.f32 %v277_v9, %v1683_v12 }
  0x1e   :  { %372 = vrot.lane.b32.xlu1 %v1926_v50, %s1620_s16  ;;  %370 = vrot.lane.b32.xlu0 %v1931_v51, %s1620_s16  ;;  %3795 = vst [vmem:[#allocation42_spill] sm:$0xff] %v2118_v61  ;;  %v2151_v61 = vld [vmem:[%s3646_s0 + $0x1a8] sm:$0xff] }
  0x1f   :  { %3796 = vst [vmem:[#allocation43_spill] sm:$0xff] %v2121_v59  ;;  %v111_v59 = vrot.slane %v1759_v32, 1 }
  0x22   :  { %376 = vrot.lane.b32.xlu1 %v1940_v52, %s1620_s16  ;;  %374 = vrot.lane.b32.xlu0 %v1945_v53, %s1620_s16 }
  0x26   :  { %380 = vrot.lane.b32.xlu1 %v1975_v18, %s1620_s16  ;;  %378 = vrot.lane.b32.xlu0 %v1980_v10, %s1620_s16 }
  0x2a   :  { %384 = vrot.lane.b32.xlu1 %v2017_v44, %s1620_s16  ;;  %382 = vrot.lane.b32.xlu0 %v2022_v43, %s1620_s16  ;;  %v128_v43 = vrot.slane %v2043_v24, 1  ;;  %v2124_v24 = vmul.f32 %v277_v9, %v1689_v13  ;;  %v2130_v44 = vld [vmem:[%s3646_s0 + $0xd0] sm:$0xff] }
  0x2c   :  { %v2095_v23 = vsel %vm141_vm0, %v110_v7, %v128_v43  ;;  %v2112_v43 = vld [vmem:[%s3646_s0 + $0x110] sm:$0xff]  ;;  %3797 = vst [vmem:[#allocation44_spill] sm:$0xff] %v2124_v24  ;;  %v2145_v24 = vmul.f32 %v277_v9, %v1694_v14 }
  0x2d   :  { %3794 = vst [vmem:[#allocation41_spill] sm:$0xff] %v2095_v23  ;;  %v137_v23 = vrot.slane %v2086_v39, 1  ;;  %v101_v41 = vrot.slane %v2112_v43, 1  ;;  %v2154_v39 = vmul.f32 %v277_v9, %v1714_v19 }
  0x2e   :  { %388 = vrot.lane.b32.xlu1 %v1955_v55, %s1620_s16  ;;  %386 = vrot.lane.b32.xlu0 %v1969_v49, %s1620_s16  ;;  %3800 = vst [vmem:[#allocation47_spill] sm:$0xff] %v2145_v24  ;;  %v138_v24 = vrot.slane %v2151_v61, 1 }
  0x2f   :  { %v2138_v7 = vsel %vm141_vm0, %v119_v62, %v137_v23  ;;  %v2142_v25 = vsel %vm141_vm0, %v101_v41, %v119_v62  ;;  %3801 = vst [vmem:[#allocation48_spill] sm:$0xff] %v2154_v39  ;;  %v129_v23 = vrot.slane %v2130_v44, 1  ;;  %v120_v62 = vrot.slane %v1780_v36, 1 }
  0x30   :  { %3798 = vst [vmem:[#allocation45_spill] sm:$0xff] %v2138_v7  ;;  %3799 = vst [vmem:[#allocation46_spill] sm:$0xff] %v2142_v25  ;;  %v93_v7 = vrot.slane %v1769_v34, 1  ;;  %v102_v25 = vrot.slane %v1785_v37, 1 }
  0x31   :  { %v2164_v41 = vsel %vm141_vm0, %v111_v59, %v129_v23  ;;  %v2174_v39 = vsel %vm141_vm0, %v120_v62, %v138_v24  ;;  %v196_v23 = vrot.slane %v1666_v5, 2  ;;  %v178_v24 = vrot.slane %v1649_v2, 2 }
  0x32   :  { %392 = vrot.lane.b32.xlu1 %v1985_v45, %s1620_s16  ;;  %390 = vrot.lane.b32.xlu0 %v1994_v17, %s1620_s16  ;;  %3802 = vst [vmem:[#allocation49_spill] sm:$0xff] %v2164_v41  ;;  %v2170_v9 = vsel %vm141_vm0, %v93_v7, %v111_v59  ;;  %3804 = vst [vmem:[#allocation51_spill] sm:$0xff] %v2174_v39  ;;  %v214_v41 = vrot.slane %v1790_v38, 2  ;;  %v2185_v59 = vsel %vm141_vm0, %v102_v25, %v120_v62 }
  0x33   :  { %3803 = vst [vmem:[#allocation50_spill] sm:$0xff] %v2170_v9  ;;  %3805 = vst [vmem:[#allocation52_spill] sm:$0xff] %v2185_v59  ;;  %v2195_v39 = vsel %vm232_vm1, %v178_v24, %v196_v23  ;;  %v205_v5 = vrot.slane %v1661_v4, 2  ;;  %v223_v38 = vrot.slane %v1800_v40, 2  ;;  %v187_v2 = vrot.slane %v1644_v1, 2 }
  0x34   :  { %v2191_v7 = vsel %vm232_vm1, %v196_v23, %v214_v41  ;;  %v197_v4 = vrot.slane %v1683_v12, 2  ;;  %v215_v62 = vrot.slane %v1820_v46, 2  ;;  %v179_v1 = vrot.slane %v1689_v13, 2 }
  0x35   :  { %v2206_v25 = vsel %vm232_vm1, %v205_v5, %v223_v38  ;;  %v2210_v41 = vsel %vm232_vm1, %v187_v2, %v205_v5  ;;  %v2220_v40 = vsub.s32 4, %v1652_v3  ;;  %v206_v46 = vrot.slane %v1694_v14, 2  ;;  %v34_v38 = vld [vmem:[%s3646_s0 + $0xa0] sm:$0xff] }
  0x36   :  { %396 = vrot.lane.b32.xlu1 %v2027_v22, %s1620_s16  ;;  %394 = vrot.lane.b32.xlu0 %v2048_v26, %s1620_s16  ;;  %v2224_v23 = vsel %vm232_vm1, %v197_v4, %v215_v62  ;;  %v2228_v12 = vsel %vm232_vm1, %v179_v1, %v197_v4  ;;  %v224_v13 = vrot.slane %v1828_v48, 2  ;;  %v188_v5 = vrot.slane %v1714_v19, 2 }
  0x37   :  { %3806 = vst [vmem:[#allocation53_spill] sm:$0xff] %v2220_v40  ;;  %3807 = vst [vmem:[#allocation54_spill] sm:$0xff] %v2224_v23  ;;  %v2233_v24 = vrot.slane %v1764_v33, %v2220_v40  ;;  %v3675_v19 = vrot.slane %v1749_v30, 2  ;;  %v216_v62 = vrot.slane %v34_v38, 2  ;;  %v2262_v1 = vsub.s32 5, %v1652_v3 }
  0x38   :  { %3808 = vst [vmem:[#allocation55_spill] sm:$0xff] %v2228_v12  ;;  %v2254_v4 = vsel %vm232_vm1, %v206_v46, %v224_v13  ;;  %v2258_v48 = vsel %vm232_vm1, %v188_v5, %v206_v46  ;;  %v61_v46 = vld [vmem:[%s3646_s0 + $0x178] sm:$0xff] }
  0x39   :  { %3809 = vst [vmem:[#allocation56_spill] sm:$0xff] %v2233_v24  ;;  %v2246_v14 = vmul.f32 %v2233_v24, %v1955_v55  ;;  %v2250_v2 = vmul.f32 %v2233_v24, %v1969_v49  ;;  %3812 = vst [vmem:[#allocation59_spill] sm:$0xff] %v2254_v4  ;;  %v2272_v13 = vsel %vm232_vm1, %v3675_v19, %v216_v62  ;;  %v2292_v62 = vsub.s32 6, %v1652_v3 }
  0x3a   :  { %400 = vrot.lane.b32.xlu1 %v2058_v42, %s1620_s16  ;;  %398 = vrot.lane.b32.xlu0 %v2091_v35, %s1620_s16  ;;  %3813 = vst [vmem:[#allocation60_spill] sm:$0xff] %v2258_v48  ;;  %3814 = vst [vmem:[#allocation61_spill] sm:$0xff] %v2262_v1  ;;  %v578_v5 = vrot.slane %v1764_v33, %v2262_v1  ;;  %v114_v24 = vrot.slane %v1846_v56, 1 }
  0x3b   :  { %3810 = vst [vmem:[#allocation57_spill] sm:$0xff] %v2246_v14  ;;  %3811 = vst [vmem:[#allocation58_spill] sm:$0xff] %v2250_v2  ;;  %v3678_v2 = vrot.slane %v1846_v56, 2  ;;  %v225_v14 = vrot.slane %v61_v46, 2 }
  0x3c   :  { %3815 = vst [vmem:[#allocation62_spill] sm:$0xff] %v2272_v13  ;;  %3818 = vst [vmem:[#allocation65_spill] sm:$0xff] %v2292_v62  ;;  %v2295_v19 = vmul.f32 %v578_v5, %v1994_v17  ;;  %v2318_v48 = vmul.f32 %v578_v5, %v2048_v26 }
  0x3d   :  { %v2301_v13 = vsel %vm232_vm1, %v3678_v2, %v225_v14  ;;  %v3686_v14 = vrot.slane %v1909_v21, 2  ;;  %v105_v2 = vrot.slane %v1749_v30, 1 }
  0x3e   :  { %404 = vrot.lane.b32.xlu1 %v2104_v11, %s1620_s16  ;;  %402 = vrot.lane.b32.xlu0 %v2112_v43, %s1620_s16  ;;  %3819 = vst [vmem:[#allocation66_spill] sm:$0xff] %v2295_v19  ;;  %3820 = vst [vmem:[#allocation67_spill] sm:$0xff] %v2301_v13 }
  0x3f   :  { %3824 = vst [vmem:[#allocation71_spill] sm:$0xff] %v2318_v48 }
  0x42   :  { %408 = vrot.lane.b32.xlu1 %v1759_v32, %s1620_s16  ;;  %406 = vrot.lane.b32.xlu0 %v1769_v34, %s1620_s16 }
  0x46   :  { %412 = vrot.lane.b32.xlu1 %v1780_v36, %s1620_s16  ;;  %410 = vrot.lane.b32.xlu0 %v1785_v37, %s1620_s16 }
  0x4a   :  { %766 = vrot.lane.b32.xlu1 %v1855_v58, %s1620_s16  ;;  %764 = vrot.lane.b32.xlu0 %v1698_v15, %s1620_s16  ;;  %v2282_v58 = vrot.slane %v1673_v8, %v2262_v1  ;;  %v2285_v15 = vmul.f32 %v578_v5, %v1985_v45 }
  0x4c   :  { %3816 = vst [vmem:[#allocation63_spill] sm:$0xff] %v2282_v58  ;;  %3817 = vst [vmem:[#allocation64_spill] sm:$0xff] %v2285_v15  ;;  %v2305_v15 = vmul.f32 %v2282_v58, %v1955_v55  ;;  %v2315_v19 = vmul.f32 %v2282_v58, %v1969_v49 }
  0x4e   :  { %770 = vrot.lane.b32.xlu1 %v1862_v60, %s1620_s16  ;;  %768 = vrot.lane.b32.xlu0 %v1702_v16, %s1620_s16  ;;  %3821 = vst [vmem:[#allocation68_spill] sm:$0xff] %v2305_v15  ;;  %v2308_v60 = vmul.f32 %v578_v5, %v2027_v22  ;;  %v35_v16 = vld [vmem:[%s3646_s0 + $0xa8] sm:$0xff]  ;;  %3823 = vst [vmem:[#allocation70_spill] sm:$0xff] %v2315_v19  ;;  %v87_v15 = vrot.slane %v1754_v31, 1  ;;  %v62_v19 = vld [vmem:[%s3646_s0 + $0x180] sm:$0xff]  ;;  %v297_v5 = vrot.slane %v1673_v8, %v2292_v62 }
  0x4f   :  { %v217_v13 = vrot.slane %v35_v16, 2 }
  0x50   :  { %3822 = vst [vmem:[#allocation69_spill] sm:$0xff] %v2308_v60  ;;  %v123_v60 = vrot.slane %v34_v38, 1  ;;  %v2342_v38 = vmul.f32 %v297_v5, %v1985_v45  ;;  %v2346_v4 = vsel %vm141_vm0, %v87_v15, %v105_v2  ;;  %v3831_v15 = vrot.slane %v1926_v50, 2 }
  0x51   :  { %v2336_v48 = vsel %vm232_vm1, %v3686_v14, %v217_v13  ;;  %3827 = vst [vmem:[#allocation74_spill] sm:$0xff] %v2346_v4  ;;  %v2353_v13 = vmul.f32 %v297_v5, %v1994_v17  ;;  %v96_v14 = vrot.slane %v1851_v57, 1 }
  0x52   :  { %774 = vrot.lane.b32.xlu1 %v1875_v6, %s1620_s16  ;;  %772 = vrot.lane.b32.xlu0 %v1733_v27, %s1620_s16  ;;  %3825 = vst [vmem:[#allocation72_spill] sm:$0xff] %v2336_v48  ;;  %v582_v6 = vrot.slane %v1764_v33, %v2292_v62  ;;  %v226_v27 = vrot.slane %v62_v19, 2  ;;  %3826 = vst [vmem:[#allocation73_spill] sm:$0xff] %v2342_v38  ;;  %v2383_v48 = vmul.f32 %v297_v5, %v2048_v26 }
  0x53   :  { %3829 = vst [vmem:[#allocation76_spill] sm:$0xff] %v2353_v13  ;;  %v132_v13 = vrot.slane %v61_v46, 1  ;;  %v2396_v46 = vsel %vm141_vm0, %v96_v14, %v114_v24  ;;  %v124_v14 = vrot.slane %v35_v16, 1  ;;  %v97_v16 = vrot.slane %v1931_v51, 1 }
  0x54   :  { %v2350_v12 = vmul.f32 %v582_v6, %v2058_v42  ;;  %v2361_v58 = vmul.f32 %v582_v6, %v2091_v35  ;;  %v2367_v38 = vsel %vm232_vm1, %v3831_v15, %v226_v27  ;;  %3836 = vst [vmem:[#allocation82_spill] sm:$0xff] %v2383_v48  ;;  %v2386_v27 = vmul.f32 %v582_v6, %v2112_v43 }
  0x55   :  { %3832 = vst [vmem:[#allocation78_spill] sm:$0xff] %v2367_v38  ;;  %v3692_v15 = vrot.slane %v1940_v52, 2  ;;  %3838 = vst [vmem:[#allocation84_spill] sm:$0xff] %v2396_v46  ;;  %v3693_v48 = vrot.slane %v1975_v18, 2 }
  0x56   :  { %3828 = vst [vmem:[#allocation75_spill] sm:$0xff] %v2350_v12  ;;  %778 = vrot.lane.b32.xlu1 %v1891_v20, %s1620_s16  ;;  %776 = vrot.lane.b32.xlu0 %v1737_v28, %s1620_s16  ;;  %3830 = vst [vmem:[#allocation77_spill] sm:$0xff] %v2361_v58  ;;  %v2370_v12 = vmul.f32 %v297_v5, %v2027_v22  ;;  %v2374_v20 = vsel %vm141_vm0, %v105_v2, %v123_v60  ;;  %v36_v28 = vld [vmem:[%s3646_s0 + $0xb0] sm:$0xff]  ;;  %v106_v2 = vrot.slane %v1909_v21, 1  ;;  %v63_v5 = vld [vmem:[%s3646_s0 + $0x188] sm:$0xff] }
  0x57   :  { %3834 = vst [vmem:[#allocation80_spill] sm:$0xff] %v2374_v20  ;;  %v2380_v58 = vmul.f32 %v582_v6, %v2104_v11  ;;  %3837 = vst [vmem:[#allocation83_spill] sm:$0xff] %v2386_v27  ;;  %v88_v60 = vrot.slane %v1914_v47, 1  ;;  %v301_v27 = vrot.slane %v1673_v8, %v1744_v29  ;;  %v227_v38 = vrot.slane %v63_v5, 2 }
  0x58   :  { %3833 = vst [vmem:[#allocation79_spill] sm:$0xff] %v2370_v12  ;;  %v218_v12 = vrot.slane %v36_v28, 2 }
  0x59   :  { %3835 = vst [vmem:[#allocation81_spill] sm:$0xff] %v2380_v58  ;;  %v2412_v58 = vsel %vm141_vm0, %v114_v24, %v132_v13  ;;  %v2416_v62 = vmul.f32 %v301_v27, %v2058_v42  ;;  %v2419_v23 = vmul.f32 %v301_v27, %v2091_v35  ;;  %v115_v24 = vrot.slane %v1926_v50, 1 }
  0x5a   :  { %782 = vrot.lane.b32.xlu1 %v2374_v20, %s1620_s16  ;;  %780 = vrot.lane.b32.xlu0 %v2346_v4, %s1620_s16  ;;  %v2406_v6 = vsel %vm232_vm1, %v3692_v15, %v218_v12  ;;  %3840 = vst [vmem:[#allocation86_spill] sm:$0xff] %v2412_v58  ;;  %v2425_v12 = vsel %vm232_vm1, %v3693_v48, %v227_v38  ;;  %v133_v48 = vrot.slane %v62_v19, 1 }
  0x5b   :  { %3839 = vst [vmem:[#allocation85_spill] sm:$0xff] %v2406_v6  ;;  %3841 = vst [vmem:[#allocation87_spill] sm:$0xff] %v2416_v62  ;;  %v2428_v15 = vmul.f32 %v301_v27, %v2104_v11  ;;  %v2438_v13 = vsel %vm141_vm0, %v106_v2, %v124_v14  ;;  %v2442_v38 = vsel %vm141_vm0, %v88_v60, %v106_v2  ;;  %v228_v62 = vrot.slane %v1950_v54, 2 }
  0x5c   :  { %3842 = vst [vmem:[#allocation88_spill] sm:$0xff] %v2419_v23  ;;  %3843 = vst [vmem:[#allocation89_spill] sm:$0xff] %v2425_v12  ;;  %v210_v23 = vrot.slane %v1955_v55, 2  ;;  %v192_v12 = vrot.slane %v1969_v49, 2  ;;  %v202_v6 = vrot.slane %v1985_v45, 2  ;;  %v2457_v19 = vsel %vm141_vm0, %v97_v16, %v115_v24 }
  0x5d   :  { %3844 = vst [vmem:[#allocation90_spill] sm:$0xff] %v2428_v15  ;;  %3845 = vst [vmem:[#allocation91_spill] sm:$0xff] %v2438_v13  ;;  %v2445_v15 = vmul.f32 %v301_v27, %v2112_v43  ;;  %v107_v27 = vrot.slane %v1940_v52, 1  ;;  %v89_v55 = vrot.slane %v1945_v53, 1  ;;  %v220_v54 = vrot.slane %v1960_v0, 2 }
  0x5e   :  { %786 = vrot.lane.b32.xlu1 %v2412_v58, %s1620_s16  ;;  %784 = vrot.lane.b32.xlu0 %v2396_v46, %s1620_s16  ;;  %3846 = vst [vmem:[#allocation92_spill] sm:$0xff] %v2442_v38  ;;  %3848 = vst [vmem:[#allocation94_spill] sm:$0xff] %v2457_v19  ;;  %v2464_v49 = vsel %vm141_vm0, %v115_v24, %v133_v48  ;;  %v125_v45 = vrot.slane %v36_v28, 1  ;;  %v2468_v2 = vsel %vm232_vm1, %v210_v23, %v228_v62 }
  0x5f   :  { %3847 = vst [vmem:[#allocation93_spill] sm:$0xff] %v2445_v15  ;;  %3849 = vst [vmem:[#allocation95_spill] sm:$0xff] %v2464_v49  ;;  %v2472_v60 = vsel %vm232_vm1, %v192_v12, %v210_v23  ;;  %v116_v14 = vrot.slane %v1975_v18, 1  ;;  %v98_v16 = vrot.slane %v1980_v10, 1  ;;  %v2478_v0 = vsel %vm232_vm1, %v202_v6, %v220_v54  ;;  %v2499_v54 = vld [vmem:[%s3646_s0 + $0xb8] sm:$0xff] }
  0x60   :  { %3850 = vst [vmem:[#allocation96_spill] sm:$0xff] %v2468_v2  ;;  %3851 = vst [vmem:[#allocation97_spill] sm:$0xff] %v2472_v60  ;;  %v184_v48 = vrot.slane %v1994_v17, 2  ;;  %v211_v62 = vrot.slane %v2027_v22, 2  ;;  %v229_v23 = vrot.slane %v2012_v63, 2  ;;  %v193_v28 = vrot.slane %v2048_v26, 2 }
  0x61   :  { %3852 = vst [vmem:[#allocation98_spill] sm:$0xff] %v2478_v0  ;;  %v2490_v12 = vsel %vm141_vm0, %v107_v27, %v125_v45  ;;  %v2494_v24 = vsel %vm141_vm0, %v89_v55, %v107_v27  ;;  %v134_v17 = vrot.slane %v63_v5, 1  ;;  %3855 = vst [vmem:[#allocation101_spill] sm:$0xff] %v2499_v54  ;;  %v203_v27 = vrot.slane %v2058_v42, 2  ;;  %v3884_v15 = vld [vmem:[#allocation37_spill] sm:$0xff] }
  0x62   :  { %790 = vrot.lane.b32.xlu1 %v2438_v13, %s1620_s16  ;;  %788 = vrot.lane.b32.xlu0 %v2442_v38, %s1620_s16  ;;  %3853 = vst [vmem:[#allocation99_spill] sm:$0xff] %v2490_v12  ;;  %3854 = vst [vmem:[#allocation100_spill] sm:$0xff] %v2494_v24  ;;  %v2503_v22 = vsel %vm232_vm1, %v184_v48, %v202_v6  ;;  %v2507_v26 = vsel %vm232_vm1, %v211_v62, %v229_v23  ;;  %v204_v5 = vrot.slane %v1759_v32, 2  ;;  %v3860_v6 = vld [vmem:[#allocation29_spill] sm:$0xff]  ;;  %v3861_v23 = vld [vmem:[#allocation30_spill] sm:$0xff] }
  0x63   :  { %3856 = vst [vmem:[#allocation102_spill] sm:$0xff] %v2503_v22  ;;  %3857 = vst [vmem:[#allocation103_spill] sm:$0xff] %v2507_v26  ;;  %v2511_v63 = vsel %vm232_vm1, %v193_v28, %v211_v62  ;;  %v186_v55 = vrot.slane %v1769_v34, 2  ;;  %v2518_v45 = vsel %vm141_vm0, %v98_v16, %v116_v14  ;;  %v108_v48 = vrot.slane %v3860_v6, 1  ;;  %v3862_v28 = vld [vmem:[#allocation33_spill] sm:$0xff]  ;;  %v3864_v26 = vld [vmem:[#allocation40_spill] sm:$0xff] }
  0x64   :  { %3858 = vst [vmem:[#allocation104_spill] sm:$0xff] %v2511_v63  ;;  %3859 = vst [vmem:[#allocation105_spill] sm:$0xff] %v2518_v45  ;;  %v126_v62 = vrot.slane %v2499_v54, 1  ;;  %v90_v42 = vrot.slane %v3861_v23, 1  ;;  %v221_v32 = vrot.slane %v3862_v28, 2  ;;  %v185_v34 = vrot.slane %v2091_v35, 2 }
  0x65   :  { %v2531_v16 = vsel %vm141_vm0, %v116_v14, %v134_v17  ;;  %v212_v63 = vrot.slane %v2104_v11, 2  ;;  %v230_v22 = vrot.slane %v3864_v26, 2  ;;  %v194_v0 = vrot.slane %v2112_v43, 2 }
  0x66   :  { %794 = vrot.lane.b32.xlu1 %v2464_v49, %s1620_s16  ;;  %792 = vrot.lane.b32.xlu0 %v2457_v19, %s1620_s16  ;;  %3863 = vst [vmem:[#allocation33_spill] sm:$0xff] %v2531_v16  ;;  %v213_v60 = vrot.slane %v1780_v36, 2  ;;  %v2539_v2 = vsel %vm232_vm1, %v203_v27, %v221_v32  ;;  %v2543_v28 = vsel %vm232_vm1, %v185_v34, %v203_v27  ;;  %v222_v35 = vrot.slane %v2130_v44, 2  ;;  %v3879_v34 = vld [vmem:[#allocation31_spill] sm:$0xff] }
  0x67   :  { %3865 = vst [vmem:[#allocation40_spill] sm:$0xff] %v2539_v2  ;;  %3866 = vst [vmem:[#allocation106_spill] sm:$0xff] %v2543_v28  ;;  %v195_v14 = vrot.slane %v1785_v37, 2  ;;  %v2553_v36 = vsel %vm232_vm1, %v212_v63, %v230_v22  ;;  %v2557_v11 = vsel %vm232_vm1, %v194_v0, %v212_v63  ;;  %v231_v37 = vrot.slane %v2151_v61, 2 }
  0x68   :  { %3867 = vst [vmem:[#allocation107_spill] sm:$0xff] %v2553_v36  ;;  %3868 = vst [vmem:[#allocation108_spill] sm:$0xff] %v2557_v11  ;;  %v2561_v43 = vsel %vm232_vm1, %v204_v5, %v222_v35  ;;  %v2566_v44 = vsel %vm141_vm0, %v108_v48, %v126_v62  ;;  %v2570_v17 = vsel %vm141_vm0, %v90_v42, %v108_v48  ;;  %v3875_v27 = vlaneseq  ;;  %v3880_v35 = vld [vmem:[#allocation32_spill] sm:$0xff] }
  0x69   :  { %3869 = vst [vmem:[#allocation109_spill] sm:$0xff] %v2561_v43  ;;  %3870 = vst [vmem:[#allocation110_spill] sm:$0xff] %v2566_v44  ;;  %v2574_v22 = vsel %vm232_vm1, %v186_v55, %v204_v5  ;;  %v2578_v0 = vsel %vm232_vm1, %v213_v60, %v231_v37  ;;  %v2582_v26 = vsel %vm232_vm1, %v195_v14, %v213_v60  ;;  %v3876_v5 = vld [vmem:[#allocation27_spill] sm:$0xff]  ;;  %v3877_v55 = vld [vmem:[#allocation28_spill] sm:$0xff]  ;;  %v2601_v32 = vsub.s32 2, %v1652_v3 }
  0x6a   :  { %798 = vrot.lane.b32.xlu1 %v2490_v12, %s1620_s16  ;;  %796 = vrot.lane.b32.xlu0 %v2494_v24, %s1620_s16  ;;  %3871 = vst [vmem:[#allocation111_spill] sm:$0xff] %v2570_v17  ;;  %3872 = vst [vmem:[#allocation112_spill] sm:$0xff] %v2574_v22  ;;  %v2589_v48 = vand.u32 127, %v3875_v27  ;;  %v2598_v60 = vld [vmem:[%s3647_s1 + $0x9] sm:$0xff]  ;;  %v3882_v27 = vld [vmem:[#allocation9_spill] sm:$0xff]  ;;  %v2613_v43 = vsub.s32 3, %v1652_v3 }
  0x6b   :  { %3873 = vst [vmem:[#allocation113_spill] sm:$0xff] %v2578_v0  ;;  %3874 = vst [vmem:[#allocation114_spill] sm:$0xff] %v2582_v26  ;;  %v3881_v14 = vld [vmem:[#allocation3_spill] sm:$0xff]  ;;  %v671_v26 = vrot.slane %v3882_v27, %v2601_v32 }
  0x6c   :  { %3878 = vst [vmem:[#allocation115_spill] sm:$0xff] %v2601_v32  ;;  %vm416_vm2 = vcmp.lt.s32.totalorder %v2589_v48, 64  ;;  %v453_v37 = vrot.slane %v2598_v60, %v3881_v14  ;;  %3883 = vst [vmem:[#allocation9_spill] sm:$0xff] %v2613_v43  ;;  %v3885_v14 = vld [vmem:[#allocation39_spill] sm:$0xff] }
  0x6d   :  { %v2624_v54 = vmul.f32 %v671_v26, %v2374_v20  ;;  %v2627_v29 = vmul.f32 %v671_v26, %v2346_v4 }
  0x6e   :  { %802 = vrot.lane.b32.xlu1 %v2531_v16, %s1620_s16  ;;  %800 = vrot.lane.b32.xlu0 %v2518_v45, %s1620_s16 }
  0x72   :  { %806 = vrot.lane.b32.xlu1 %v2566_v44, %s1620_s16  ;;  %804 = vrot.lane.b32.xlu0 %v2570_v17, %s1620_s16  ;;  %v3890_v44 = vld [vmem:[#allocation35_spill] sm:$0xff] }
  0x74   :  { %v347_v61 = vpop.permute.xlu1 %346  ;;  %v343_v63 = vpop.permute.xlu0 %342 }
  0x76   :  { %810 = vrot.lane.b32.xlu1 %v3876_v5, %s1620_s16  ;;  %808 = vrot.lane.b32.xlu0 %v3877_v55, %s1620_s16  ;;  %v3888_v5 = vld [vmem:[#allocation10_spill] sm:$0xff] }
  0x77   :  { %v457_v17 = vrot.slane %v2598_v60, %v3888_v5 }
  0x78   :  { %v349_v62 = vpop.permute.xlu1 %348  ;;  %v345_v42 = vpop.permute.xlu0 %344 }
  0x7a   :  { %814 = vrot.lane.b32.xlu1 %v3879_v34, %s1620_s16  ;;  %812 = vrot.lane.b32.xlu0 %v3880_v35, %s1620_s16  ;;  %v2632_v35 = vmul.f32 %v671_v26, %v2412_v58  ;;  %v562_v58 = vrot.slane %v1764_v33, %v3888_v5 }
  0x7c   :  { %v353_v0 = vpop.permute.xlu1 %352  ;;  %v351_v22 = vpop.permute.xlu0 %350  ;;  %v612_v6 = vmul.f32 %v562_v58, %v1851_v57 }
  0x7d   :  { %v446_v11 = vsel %vm416_vm2, %v345_v42, %v353_v0  ;;  %v445_v36 = vsel %vm416_vm2, %v343_v63, %v351_v22  ;;  %v675_v42 = vrot.slane %v3882_v27, %v2613_v43 }
  0x7e   :  { %v498_v28 = vmul.f32 %v453_v37, %v446_v11  ;;  %v490_v2 = vmul.f32 %v453_v37, %v445_v36  ;;  %818 = vrot.lane.b32.xlu1 %v3884_v15, %s1620_s16  ;;  %816 = vrot.lane.b32.xlu0 %v3885_v14, %s1620_s16  ;;  %v2635_v36 = vmul.f32 %v671_v26, %v2396_v46  ;;  %v3886_v11 = vld [vmem:[#allocation7_spill] sm:$0xff]  ;;  %v3887_v15 = vld [vmem:[#allocation5_spill] sm:$0xff]  ;;  %v3889_v26 = vld [vmem:[#allocation34_spill] sm:$0xff] }
  0x7f   :  { %v2658_v16 = vmul.f32 %v675_v42, %v2464_v49  ;;  %v2661_v5 = vmul.f32 %v675_v42, %v2457_v19  ;;  %v604_v49 = vmul.f32 %v562_v58, %v1749_v30  ;;  %v596_v19 = vmul.f32 %v562_v58, %v1754_v31 }
  0x80   :  { %v530_v63 = vadd.f32 %v498_v28, %v3886_v11  ;;  %v522_v34 = vadd.f32 %v490_v2, %v3887_v15  ;;  %v357_v14 = vpop.permute.xlu1 %356  ;;  %v355_v55 = vpop.permute.xlu0 %354  ;;  %v3891_v2 = vld [vmem:[#allocation41_spill] sm:$0xff] }
  0x81   :  { %v448_v20 = vsel %vm416_vm2, %v349_v62, %v357_v14  ;;  %v447_v4 = vsel %vm416_vm2, %v347_v61, %v355_v55  ;;  %v2652_v62 = vmul.f32 %v675_v42, %v2438_v13  ;;  %v2655_v61 = vmul.f32 %v675_v42, %v2442_v38  ;;  %3894 = vst [vmem:[#allocation34_spill] sm:$0xff] %v2658_v16  ;;  %v3899_v13 = vld [vmem:[#allocation17_spill] sm:$0xff]  ;;  %v3901_v38 = vld [vmem:[#allocation15_spill] sm:$0xff]  ;;  %v3910_v16 = vld [vmem:[#allocation16_spill] sm:$0xff] }
  0x82   :  { %v635_v46 = vadd.f32 %v3889_v26, %v530_v63  ;;  %v627_v28 = vadd.f32 %v3890_v44, %v522_v34  ;;  %v514_v11 = vmul.f32 %v453_v37, %v448_v20  ;;  %v506_v15 = vmul.f32 %v453_v37, %v447_v4  ;;  %822 = vrot.lane.b32.xlu1 %v3891_v2, %s1620_s16  ;;  %v3896_v63 = vld [vmem:[#allocation42_spill] sm:$0xff]  ;;  %v3898_v44 = vld [vmem:[#allocation4_spill] sm:$0xff] }
  0x83   :  { %3892 = vst [vmem:[#allocation7_spill] sm:$0xff] %v2652_v62  ;;  %3893 = vst [vmem:[#allocation5_spill] sm:$0xff] %v2655_v61  ;;  %820 = vrot.lane.b32.xlu0 %v3896_v63, %s1620_s16  ;;  %v3897_v20 = vld [vmem:[#allocation6_spill] sm:$0xff] }
  0x84   :  { %3895 = vst [vmem:[#allocation35_spill] sm:$0xff] %v2661_v5  ;;  %v546_v4 = vadd.f32 %v514_v11, %v3897_v20  ;;  %v538_v34 = vadd.f32 %v506_v15, %v3898_v44  ;;  %v361_v37 = vpop.permute.xlu1 %360  ;;  %v359_v26 = vpop.permute.xlu0 %358  ;;  %v2668_v2 = vadd.f32 %v3899_v13, %v635_v46  ;;  %v2671_v3 = vadd.f32 %v3901_v38, %v627_v28  ;;  %v3903_v20 = vld [vmem:[#allocation36_spill] sm:$0xff]  ;;  %v3904_v44 = vld [vmem:[#allocation38_spill] sm:$0xff]  ;;  %v3905_v13 = vld [vmem:[#allocation45_spill] sm:$0xff] }
  0x85   :  { %v442_v42 = vsel %vm416_vm2, %v353_v0, %v361_v37  ;;  %v441_v11 = vsel %vm416_vm2, %v351_v22, %v359_v26  ;;  %v2685_v38 = vrot.slane %v3882_v27, %v2220_v40  ;;  %v3906_v0 = vld [vmem:[#allocation46_spill] sm:$0xff]  ;;  %v620_v28 = vmul.f32 %v562_v58, %v1846_v56 }
  0x86   :  { %3900 = vst [vmem:[#allocation6_spill] sm:$0xff] %v2668_v2  ;;  %3902 = vst [vmem:[#allocation4_spill] sm:$0xff] %v2671_v3  ;;  %v651_v15 = vadd.f32 %v3903_v20, %v546_v4  ;;  %v643_v63 = vadd.f32 %v3904_v44, %v538_v34  ;;  %v499_v5 = vmul.f32 %v457_v17, %v442_v42  ;;  %826 = vrot.lane.b32.xlu1 %v3905_v13, %s1620_s16  ;;  %v3907_v34 = vld [vmem:[#allocation43_spill] sm:$0xff]  ;;  %v3909_v2 = vld [vmem:[#allocation18_spill] sm:$0xff] }
  0x87   :  { %v491_v46 = vmul.f32 %v457_v17, %v441_v11  ;;  %824 = vrot.lane.b32.xlu0 %v3906_v0, %s1620_s16  ;;  %v281_v22 = vrot.slane %v1673_v8, %v2601_v32  ;;  %v566_v4 = vrot.slane %v1764_v33, %v2601_v32  ;;  %v3908_v11 = vld [vmem:[#allocation44_spill] sm:$0xff] }
  0x88   :  { %v531_v42 = vadd.f32 %v499_v5, %v3907_v34  ;;  %v365_v44 = vpop.permute.xlu1 %364  ;;  %v363_v3 = vpop.permute.xlu0 %362  ;;  %v2697_v13 = vadd.f32 %v3909_v2, %v651_v15  ;;  %v2700_v23 = vadd.f32 %v3910_v16, %v643_v63  ;;  %v461_v5 = vrot.slane %v2598_v60, %v2601_v32  ;;  %v3912_v2 = vld [vmem:[#allocation49_spill] sm:$0xff]  ;;  %v3914_v63 = vld [vmem:[#allocation48_spill] sm:$0xff] }
  0x89   :  { %v523_v20 = vadd.f32 %v491_v46, %v3908_v11  ;;  %v444_v0 = vsel %vm416_vm2, %v357_v14, %v365_v44  ;;  %v443_v61 = vsel %vm416_vm2, %v355_v55, %v363_v3  ;;  %v2713_v16 = vrot.slane %v3882_v27, %v2262_v1  ;;  %v3916_v27 = vld [vmem:[#allocation19_spill] sm:$0xff] }
  0x8a   :  { %3911 = vst [vmem:[#allocation17_spill] sm:$0xff] %v2700_v23  ;;  %v636_v46 = vadd.f32 %v604_v49, %v531_v42  ;;  %v515_v11 = vmul.f32 %v457_v17, %v444_v0  ;;  %v507_v62 = vmul.f32 %v457_v17, %v443_v61  ;;  %830 = vrot.lane.b32.xlu1 %v3912_v2, %s1620_s16  ;;  %v3913_v49 = vld [vmem:[#allocation47_spill] sm:$0xff]  ;;  %v3915_v0 = vld [vmem:[#allocation20_spill] sm:$0xff] }
  0x8b   :  { %v628_v34 = vadd.f32 %v596_v19, %v523_v20  ;;  %828 = vrot.lane.b32.xlu0 %v2170_v9, %s1620_s16  ;;  %v320_v58 = vmul.f32 %v281_v22, %v1749_v30  ;;  %v605_v55 = vmul.f32 %v566_v4, %v1909_v21  ;;  %v312_v14 = vmul.f32 %v281_v22, %v1754_v31 }
  0x8c   :  { %v547_v19 = vadd.f32 %v515_v11, %v3913_v49  ;;  %v539_v17 = vadd.f32 %v507_v62, %v3914_v63  ;;  %v369_v61 = vpop.permute.xlu1 %368  ;;  %v367_v15 = vpop.permute.xlu0 %366  ;;  %v2723_v42 = vadd.f32 %v3915_v0, %v636_v46  ;;  %v597_v2 = vmul.f32 %v566_v4, %v1914_v47  ;;  %v3917_v46 = vld [vmem:[#allocation51_spill] sm:$0xff] }
  0x8d   :  { %v2726_v20 = vadd.f32 %v3916_v27, %v628_v34  ;;  %v438_v9 = vsel %vm416_vm2, %v361_v37, %v369_v61  ;;  %v437_v32 = vsel %vm416_vm2, %v359_v26, %v367_v15  ;;  %v336_v11 = vmul.f32 %v281_v22, %v1846_v56 }
  0x8e   :  { %v652_v49 = vadd.f32 %v620_v28, %v547_v19  ;;  %v644_v62 = vadd.f32 %v612_v6, %v539_v17  ;;  %v500_v63 = vmul.f32 %v461_v5, %v438_v9  ;;  %v492_v23 = vmul.f32 %v461_v5, %v437_v32  ;;  %834 = vrot.lane.b32.xlu1 %v3917_v46, %s1620_s16  ;;  %v3918_v32 = vld [vmem:[#allocation23_spill] sm:$0xff]  ;;  %v3919_v17 = vld [vmem:[#allocation25_spill] sm:$0xff] }
  0x8f   :  { %832 = vrot.lane.b32.xlu0 %v2185_v59, %s1620_s16  ;;  %v621_v34 = vmul.f32 %v566_v4, %v1926_v50  ;;  %v328_v37 = vmul.f32 %v281_v22, %v1851_v57  ;;  %v613_v0 = vmul.f32 %v566_v4, %v1931_v51  ;;  %v285_v26 = vrot.slane %v1673_v8, %v2613_v43 }
  0x90   :  { %v532_v27 = vadd.f32 %v500_v63, %v320_v58  ;;  %v524_v28 = vadd.f32 %v492_v23, %v312_v14  ;;  %v373_v6 = vpop.permute.xlu1 %372  ;;  %v371_v9 = vpop.permute.xlu0 %370  ;;  %v2744_v19 = vadd.f32 %v3918_v32, %v652_v49  ;;  %v2747_v46 = vadd.f32 %v3919_v17, %v644_v62 }
  0x91   :  { %v440_v59 = vsel %vm416_vm2, %v365_v44, %v373_v6  ;;  %v439_v22 = vsel %vm416_vm2, %v363_v3, %v371_v9  ;;  %v465_v4 = vrot.slane %v2598_v60, %v2613_v43  ;;  %v570_v23 = vrot.slane %v1764_v33, %v2613_v43 }
  0x92   :  { %v637_v58 = vadd.f32 %v605_v55, %v532_v27  ;;  %v629_v14 = vadd.f32 %v597_v2, %v524_v28  ;;  %v516_v63 = vmul.f32 %v461_v5, %v440_v59  ;;  %v508_v49 = vmul.f32 %v461_v5, %v439_v22  ;;  %1185 = vrot.lane.b32.xlu1 %v2191_v7, %s1620_s16 }
  0x93   :  { %v2761_v62 = vmul.f32 %v2685_v38, %v2490_v12  ;;  %v2765_v3 = vmul.f32 %v2685_v38, %v2494_v24  ;;  %1183 = vrot.lane.b32.xlu0 %v2195_v39, %s1620_s16  ;;  %v321_v33 = vmul.f32 %v285_v26, %v1909_v21  ;;  %v313_v44 = vmul.f32 %v285_v26, %v1914_v47 }
  0x94   :  { %v548_v59 = vadd.f32 %v516_v63, %v336_v11  ;;  %v540_v5 = vadd.f32 %v508_v49, %v328_v37  ;;  %v377_v2 = vpop.permute.xlu1 %376  ;;  %v375_v55 = vpop.permute.xlu0 %374  ;;  %v2772_v27 = vadd.f32 %v2624_v54, %v637_v58  ;;  %v2775_v28 = vadd.f32 %v2627_v29, %v629_v14 }
  0x95   :  { %v606_v32 = vmul.f32 %v570_v23, %v1940_v52  ;;  %v434_v17 = vsel %vm416_vm2, %v369_v61, %v377_v2  ;;  %v598_v22 = vmul.f32 %v570_v23, %v1945_v53  ;;  %v433_v24 = vsel %vm416_vm2, %v367_v15, %v375_v55 }
  0x96   :  { %3920 = vst [vmem:[#allocation15_spill] sm:$0xff] %v2772_v27  ;;  %3921 = vst [vmem:[#allocation36_spill] sm:$0xff] %v2775_v28  ;;  %v653_v11 = vadd.f32 %v621_v34, %v548_v59  ;;  %v645_v37 = vadd.f32 %v613_v0, %v540_v5  ;;  %v501_v63 = vmul.f32 %v465_v4, %v434_v17  ;;  %1189 = vrot.lane.b32.xlu1 %v2206_v25, %s1620_s16  ;;  %v3940_v27 = vld [vmem:[#allocation33_spill] sm:$0xff] }
  0x97   :  { %v493_v49 = vmul.f32 %v465_v4, %v433_v24  ;;  %1187 = vrot.lane.b32.xlu0 %v2210_v41, %s1620_s16  ;;  %v337_v29 = vmul.f32 %v285_v26, %v1926_v50  ;;  %v622_v54 = vmul.f32 %v570_v23, %v1975_v18  ;;  %v329_v61 = vmul.f32 %v285_v26, %v1931_v51 }
  0x98   :  { %v289_v58 = vrot.slane %v1673_v8, %v2220_v40  ;;  %v533_v15 = vadd.f32 %v501_v63, %v321_v33  ;;  %v381_v0 = vpop.permute.xlu1 %380  ;;  %v379_v14 = vpop.permute.xlu0 %378  ;;  %v2793_v24 = vadd.f32 %v2632_v35, %v653_v11  ;;  %v2796_v59 = vadd.f32 %v2635_v36, %v645_v37  ;;  %v3924_v35 = vld [vmem:[#allocation54_spill] sm:$0xff] }
  0x99   :  { %v525_v34 = vadd.f32 %v493_v49, %v313_v44  ;;  %v436_v5 = vsel %vm416_vm2, %v373_v6, %v381_v0  ;;  %v614_v17 = vmul.f32 %v570_v23, %v1980_v10  ;;  %v435_v26 = vsel %vm416_vm2, %v371_v9, %v379_v14  ;;  %v3925_v6 = vld [vmem:[#allocation55_spill] sm:$0xff] }
  0x9a   :  { %3922 = vst [vmem:[#allocation38_spill] sm:$0xff] %v2793_v24  ;;  %3923 = vst [vmem:[#allocation43_spill] sm:$0xff] %v2796_v59  ;;  %v469_v8 = vrot.slane %v2598_v60, %v2220_v40  ;;  %v638_v33 = vadd.f32 %v606_v32, %v533_v15  ;;  %v517_v63 = vmul.f32 %v465_v4, %v436_v5  ;;  %1193 = vrot.lane.b32.xlu1 %v3924_v35, %s1620_s16  ;;  %v3926_v15 = vld [vmem:[#allocation7_spill] sm:$0xff]  ;;  %v3928_v5 = vld [vmem:[#allocation5_spill] sm:$0xff] }
  0x9b   :  { %v630_v44 = vadd.f32 %v598_v22, %v525_v34  ;;  %v509_v49 = vmul.f32 %v465_v4, %v435_v26  ;;  %v2809_v36 = vmul.f32 %v2685_v38, %v2518_v45  ;;  %1191 = vrot.lane.b32.xlu0 %v3925_v6, %s1620_s16  ;;  %v322_v23 = vmul.f32 %v289_v58, %v1940_v52  ;;  %v3930_v40 = vld [vmem:[#allocation29_spill] sm:$0xff]  ;;  %v3931_v45 = vld [vmem:[#allocation56_spill] sm:$0xff]  ;;  %v3932_v24 = vld [vmem:[#allocation30_spill] sm:$0xff] }
  0x9c   :  { %v314_v9 = vmul.f32 %v289_v58, %v1945_v53  ;;  %v180_v11 = vrot.slane %v1754_v31, 2  ;;  %v549_v32 = vadd.f32 %v517_v63, %v337_v29  ;;  %v385_v37 = vpop.permute.xlu1 %384  ;;  %v383_v4 = vpop.permute.xlu0 %382  ;;  %v2817_v34 = vadd.f32 %v3926_v15, %v638_v33 }
  0x9d   :  { %v541_v22 = vadd.f32 %v509_v49, %v329_v61  ;;  %v2820_v26 = vadd.f32 %v3928_v5, %v630_v44  ;;  %v607_v12 = vmul.f32 %v3931_v45, %v3930_v40  ;;  %v430_v59 = vsel %vm416_vm2, %v377_v2, %v385_v37  ;;  %v3933_v49 = vld [vmem:[#allocation59_spill] sm:$0xff]  ;;  %v3934_v44 = vld [vmem:[#allocation60_spill] sm:$0xff] }
  0x9e   :  { %3927 = vst [vmem:[#allocation44_spill] sm:$0xff] %v2817_v34  ;;  %v599_v43 = vmul.f32 %v3931_v45, %v3932_v24  ;;  %v429_v31 = vsel %vm416_vm2, %v375_v55, %v383_v4  ;;  %v654_v29 = vadd.f32 %v622_v54, %v549_v32  ;;  %v502_v63 = vmul.f32 %v469_v8, %v430_v59  ;;  %v3939_v34 = vld [vmem:[#allocation35_spill] sm:$0xff] }
  0x9f   :  { %3929 = vst [vmem:[#allocation18_spill] sm:$0xff] %v2820_v26  ;;  %v646_v61 = vadd.f32 %v614_v17, %v541_v22  ;;  %v494_v33 = vmul.f32 %v469_v8, %v429_v31  ;;  %1197 = vrot.lane.b32.xlu1 %v3933_v49, %s1620_s16  ;;  %1195 = vrot.lane.b32.xlu0 %v3934_v44, %s1620_s16  ;;  %v3935_v5 = vrot.slane %v1749_v30, 2  ;;  %v189_v55 = vrot.slane %v1851_v57, 2  ;;  %v3938_v22 = vld [vmem:[#allocation34_spill] sm:$0xff] }
  0xa0   :  { %v338_v15 = vmul.f32 %v289_v58, %v1975_v18  ;;  %v330_v2 = vmul.f32 %v289_v58, %v1980_v10  ;;  %v534_v54 = vadd.f32 %v502_v63, %v322_v23  ;;  %v389_v17 = vpop.permute.xlu1 %388  ;;  %v387_v32 = vpop.permute.xlu0 %386  ;;  %v2844_v31 = vadd.f32 %v3938_v22, %v654_v29 }
  0xa1   :  { %v2840_v26 = vsel %vm232_vm1, %v180_v11, %v3935_v5  ;;  %v526_v59 = vadd.f32 %v494_v33, %v314_v9  ;;  %v2847_v28 = vadd.f32 %v3939_v34, %v646_v61  ;;  %v728_v58 = vmul.f32 %v2685_v38, %v3940_v27  ;;  %v3941_v33 = vld [vmem:[#allocation62_spill] sm:$0xff]  ;;  %v3942_v38 = vld [vmem:[#allocation63_spill] sm:$0xff] }
  0xa2   :  { %3937 = vst [vmem:[#allocation16_spill] sm:$0xff] %v2840_v26  ;;  %v432_v30 = vsel %vm416_vm2, %v381_v0, %v389_v17  ;;  %v431_v11 = vsel %vm416_vm2, %v379_v14, %v387_v32  ;;  %v473_v57 = vrot.slane %v2598_v60, %v2262_v1  ;;  %v639_v23 = vadd.f32 %v607_v12, %v534_v54 }
  0xa3   :  { %v631_v9 = vadd.f32 %v599_v43, %v526_v59  ;;  %v518_v63 = vmul.f32 %v469_v8, %v432_v30  ;;  %v510_v29 = vmul.f32 %v469_v8, %v431_v11  ;;  %1201 = vrot.lane.b32.xlu1 %v3941_v33, %s1620_s16  ;;  %1199 = vrot.lane.b32.xlu0 %v2840_v26, %s1620_s16  ;;  %v3943_v14 = vrot.slane %v1846_v56, 2  ;;  %v3947_v30 = vld [vmem:[#allocation58_spill] sm:$0xff]  ;;  %v3948_v11 = vld [vmem:[#allocation67_spill] sm:$0xff] }
  0xa4   :  { %v323_v34 = vmul.f32 %v3942_v38, %v3930_v40  ;;  %v315_v0 = vmul.f32 %v3942_v38, %v3932_v24  ;;  %v181_v43 = vrot.slane %v1914_v47, 2  ;;  %v393_v5 = vpop.permute.xlu1 %392  ;;  %v391_v54 = vpop.permute.xlu0 %390  ;;  %v2873_v59 = vadd.f32 %v2761_v62, %v639_v23  ;;  %v3949_v62 = vld [vmem:[#allocation110_spill] sm:$0xff] }
  0xa5   :  { %v2869_v12 = vsel %vm232_vm1, %v189_v55, %v3943_v14  ;;  %v550_v8 = vadd.f32 %v518_v63, %v338_v15  ;;  %v542_v61 = vadd.f32 %v510_v29, %v330_v2  ;;  %v2876_v40 = vadd.f32 %v2765_v3, %v631_v9  ;;  %v3946_v55 = vld [vmem:[#allocation57_spill] sm:$0xff]  ;;  %v3950_v3 = vld [vmem:[#allocation111_spill] sm:$0xff] }
  0xa6   :  { %3944 = vst [vmem:[#allocation47_spill] sm:$0xff] %v2873_v59  ;;  %v426_v24 = vsel %vm416_vm2, %v385_v37, %v393_v5  ;;  %v425_v56 = vsel %vm416_vm2, %v383_v4, %v391_v54  ;;  %v713_v23 = vmul.f32 %v2713_v16, %v3949_v62  ;;  %v705_v9 = vmul.f32 %v2713_v16, %v3950_v3  ;;  %v3966_v59 = vld [vmem:[#allocation32_spill] sm:$0xff] }
  0xa7   :  { %3945 = vst [vmem:[#allocation48_spill] sm:$0xff] %v2876_v40  ;;  %v655_v22 = vadd.f32 %v3946_v55, %v550_v8  ;;  %v647_v47 = vadd.f32 %v3947_v30, %v542_v61  ;;  %v503_v15 = vmul.f32 %v473_v57, %v426_v24  ;;  %v495_v2 = vmul.f32 %v473_v57, %v425_v56  ;;  %v1616_v56 = vld [vmem:[%s3647_s1 + $0x1b] sm:$0xff] }
  0xa8   :  { %1205 = vrot.lane.b32.xlu1 %v3948_v11, %s1620_s16  ;;  %1203 = vrot.lane.b32.xlu0 %v2869_v12, %s1620_s16  ;;  %v3951_v37 = vrot.slane %v1909_v21, 2  ;;  %v190_v63 = vrot.slane %v1931_v51, 2  ;;  %v397_v14 = vpop.permute.xlu1 %396  ;;  %v395_v8 = vpop.permute.xlu0 %394  ;;  %v3954_v21 = vld [vmem:[#allocation65_spill] sm:$0xff] }
  0xa9   :  { %v535_v29 = vadd.f32 %v503_v15, %v323_v34  ;;  %v527_v38 = vadd.f32 %v495_v2, %v315_v0  ;;  %v2899_v61 = vadd.f32 %v728_v58, %v655_v22  ;;  %v2902_v24 = vadd.f32 %v2809_v36, %v647_v47  ;;  %v3955_v58 = vld [vmem:[#allocation64_spill] sm:$0xff]  ;;  %v3956_v22 = vld [vmem:[#allocation66_spill] sm:$0xff]  ;;  %v3958_v2 = vld [vmem:[#allocation27_spill] sm:$0xff] }
  0xaa   :  { %v2896_v4 = vsel %vm232_vm1, %v181_v43, %v3951_v37  ;;  %v687_v55 = vrot.slane %v1616_v56, %v3954_v21  ;;  %v428_v43 = vsel %vm416_vm2, %v389_v17, %v397_v14  ;;  %v427_v51 = vsel %vm416_vm2, %v387_v32, %v395_v8  ;;  %v3957_v15 = vld [vmem:[#allocation72_spill] sm:$0xff] }
  0xab   :  { %3952 = vst [vmem:[#allocation20_spill] sm:$0xff] %v2899_v61  ;;  %3953 = vst [vmem:[#allocation19_spill] sm:$0xff] %v2902_v24  ;;  %v477_v34 = vrot.slane %v2598_v60, %v3954_v21  ;;  %v640_v0 = vadd.f32 %v3955_v58, %v535_v29  ;;  %v632_v36 = vadd.f32 %v3956_v22, %v527_v38  ;;  %v3959_v24 = vld [vmem:[#allocation28_spill] sm:$0xff]  ;;  %v3960_v32 = vrot.slane %v1926_v50, 2 }
  0xac   :  { %v519_v30 = vmul.f32 %v473_v57, %v428_v43  ;;  %v511_v47 = vmul.f32 %v473_v57, %v427_v51  ;;  %1209 = vrot.lane.b32.xlu1 %v3957_v15, %s1620_s16  ;;  %v729_v37 = vmul.f32 %v2713_v16, %v3958_v2  ;;  %v721_v17 = vmul.f32 %v2713_v16, %v3959_v24  ;;  %v3961_v38 = vld [vmem:[#allocation68_spill] sm:$0xff]  ;;  %v3962_v51 = vld [vmem:[#allocation70_spill] sm:$0xff]  ;;  %v401_v22 = vpop.permute.xlu1 %400  ;;  %v399_v21 = vpop.permute.xlu0 %398  ;;  %v3965_v24 = vld [vmem:[#allocation31_spill] sm:$0xff] }
  0xad   :  { %1207 = vrot.lane.b32.xlu0 %v2896_v4, %s1620_s16  ;;  %v2928_v29 = vsel %vm232_vm1, %v190_v63, %v3960_v32  ;;  %v182_v57 = vrot.slane %v1945_v53, 2  ;;  %v2933_v61 = vadd.f32 %v713_v23, %v640_v0  ;;  %v2935_v16 = vadd.f32 %v705_v9, %v632_v36  ;;  %v3967_v32 = vld [vmem:[#allocation69_spill] sm:$0xff]  ;;  %v3969_v23 = vld [vmem:[#allocation78_spill] sm:$0xff]  ;;  %v3971_v36 = vld [vmem:[#allocation8_spill] sm:$0xff] }
  0xae   :  { %v551_v43 = vadd.f32 %v519_v30, %v3961_v38  ;;  %v543_v58 = vadd.f32 %v511_v47, %v3962_v51  ;;  %v714_v40 = vmul.f32 %v687_v55, %v3965_v24  ;;  %v706_v50 = vmul.f32 %v687_v55, %v3966_v59  ;;  %v3968_v38 = vld [vmem:[#allocation71_spill] sm:$0xff]  ;;  %v3970_v9 = vld [vmem:[#allocation37_spill] sm:$0xff] }
  0xaf   :  { %3963 = vst [vmem:[#allocation23_spill] sm:$0xff] %v2933_v61  ;;  %3964 = vst [vmem:[#allocation25_spill] sm:$0xff] %v2935_v16  ;;  %v422_v63 = vsel %vm416_vm2, %v393_v5, %v401_v22  ;;  %v421_v53 = vsel %vm416_vm2, %v391_v54, %v399_v21  ;;  %v730_v0 = vmul.f32 %v687_v55, %v3970_v9  ;;  %v3972_v5 = vrot.slane %v1940_v52, 2  ;;  %v3977_v59 = vld [vmem:[#allocation39_spill] sm:$0xff] }
  0xb0   :  { %v656_v30 = vadd.f32 %v3967_v32, %v551_v43  ;;  %v648_v47 = vadd.f32 %v3968_v38, %v543_v58  ;;  %v504_v51 = vmul.f32 %v477_v34, %v422_v63  ;;  %v496_v1 = vmul.f32 %v477_v34, %v421_v53  ;;  %1213 = vrot.lane.b32.xlu1 %v3969_v23, %s1620_s16  ;;  %v3973_v58 = vld [vmem:[#allocation73_spill] sm:$0xff]  ;;  %v3974_v53 = vld [vmem:[#allocation76_spill] sm:$0xff]  ;;  %v405_v38 = vpop.permute.xlu1 %404  ;;  %v403_v61 = vpop.permute.xlu0 %402 }
  0xb1   :  { %v691_v16 = vrot.slane %v1616_v56, %v3971_v36  ;;  %1211 = vrot.lane.b32.xlu0 %v2928_v29, %s1620_s16  ;;  %v2955_v54 = vsel %vm232_vm1, %v182_v57, %v3972_v5  ;;  %v191_v43 = vrot.slane %v1980_v10, 2  ;;  %v722_v24 = vmul.f32 %v687_v55, %v3977_v59 }
  0xb2   :  { %v536_v63 = vadd.f32 %v504_v51, %v3973_v58  ;;  %v528_v32 = vadd.f32 %v496_v1, %v3974_v53  ;;  %v2960_v9 = vadd.f32 %v729_v37, %v656_v30  ;;  %v2962_v56 = vadd.f32 %v721_v17, %v648_v47  ;;  %v3978_v51 = vld [vmem:[#allocation75_spill] sm:$0xff]  ;;  %v3979_v1 = vld [vmem:[#allocation77_spill] sm:$0xff] }
  0xb3   :  { %v424_v52 = vsel %vm416_vm2, %v397_v14, %v405_v38  ;;  %v423_v57 = vsel %vm416_vm2, %v395_v8, %v403_v61  ;;  %v481_v10 = vrot.slane %v2598_v60, %v3971_v36  ;;  %v3980_v17 = vld [vmem:[#allocation85_spill] sm:$0xff]  ;;  %v3981_v14 = vrot.slane %v1975_v18, 2  ;;  %v1617_v60 = vld [vmem:[%s3646_s0 + $0x70] sm:$0xff] }
  0xb4   :  { %3975 = vst [vmem:[#allocation7_spill] sm:$0xff] %v2960_v9  ;;  %3976 = vst [vmem:[#allocation5_spill] sm:$0xff] %v2962_v56  ;;  %v641_v5 = vadd.f32 %v3978_v51, %v536_v63  ;;  %v633_v58 = vadd.f32 %v3979_v1, %v528_v32  ;;  %v520_v53 = vmul.f32 %v477_v34, %v424_v52  ;;  %1217 = vrot.lane.b32.xlu1 %v3980_v17, %s1620_s16  ;;  %v3982_v30 = vld [vmem:[#allocation101_spill] sm:$0xff]  ;;  %v3983_v32 = vld [vmem:[#allocation79_spill] sm:$0xff]  ;;  %v409_v51 = vpop.permute.xlu1 %408  ;;  %v407_v1 = vpop.permute.xlu0 %406 }
  0xb5   :  { %v512_v37 = vmul.f32 %v477_v34, %v423_v57  ;;  %1215 = vrot.lane.b32.xlu0 %v2955_v54, %s1620_s16  ;;  %v2981_v8 = vsel %vm232_vm1, %v191_v43, %v3981_v14  ;;  %v201_v55 = vrot.slane %v1617_v60, 2  ;;  %v219_v47 = vrot.slane %v3982_v30, 2  ;;  %v1618_v34 = vld [vmem:[%s3646_s0 + $0x28] sm:$0xff]  ;;  %v3984_v57 = vld [vmem:[#allocation82_spill] sm:$0xff]  ;;  %v3987_v36 = vld [vmem:[#allocation81_spill] sm:$0xff] }
  0xb6   :  { %v183_v63 = vrot.slane %v1618_v34, 2  ;;  %v552_v52 = vadd.f32 %v520_v53, %v3983_v32  ;;  %v2992_v43 = vadd.f32 %v714_v40, %v641_v5  ;;  %v2994_v14 = vadd.f32 %v706_v50, %v633_v58  ;;  %v3988_v9 = vld [vmem:[#allocation83_spill] sm:$0xff]  ;;  %v3990_v32 = vld [vmem:[#allocation41_spill] sm:$0xff]  ;;  %v3991_v5 = vld [vmem:[#allocation42_spill] sm:$0xff] }
  0xb7   :  { %v544_v18 = vadd.f32 %v512_v37, %v3984_v57  ;;  %v418_v60 = vsel %vm416_vm2, %v401_v22, %v409_v51  ;;  %v417_v30 = vsel %vm416_vm2, %v399_v21, %v407_v1  ;;  %v3989_v37 = vld [vmem:[#allocation89_spill] sm:$0xff]  ;;  %v715_v40 = vmul.f32 %v691_v16, %v3990_v32  ;;  %v3993_v58 = vld [vmem:[#allocation88_spill] sm:$0xff] }
  0xb8   :  { %3985 = vst [vmem:[#allocation29_spill] sm:$0xff] %v2992_v43  ;;  %3986 = vst [vmem:[#allocation56_spill] sm:$0xff] %v2994_v14  ;;  %v657_v56 = vadd.f32 %v3987_v36, %v552_v52  ;;  %v505_v59 = vmul.f32 %v481_v10, %v418_v60  ;;  %v497_v53 = vmul.f32 %v481_v10, %v417_v30  ;;  %1221 = vrot.lane.b32.xlu1 %v3989_v37, %s1620_s16  ;;  %v413_v57 = vpop.permute.xlu1 %412  ;;  %v3996_v30 = vld [vmem:[#allocation11_spill] sm:$0xff] }
  0xb9   :  { %v649_v34 = vadd.f32 %v3988_v9, %v544_v18  ;;  %v707_v50 = vmul.f32 %v691_v16, %v3991_v5  ;;  %1219 = vrot.lane.b32.xlu0 %v2981_v8, %s1620_s16  ;;  %v3010_v22 = vsel %vm232_vm1, %v201_v55, %v219_v47  ;;  %v3014_v21 = vsel %vm232_vm1, %v183_v63, %v201_v55  ;;  %v3992_v9 = vld [vmem:[#allocation87_spill] sm:$0xff]  ;;  %v411_v18 = vpop.permute.xlu0 %410  ;;  %v3997_v55 = vld [vmem:[#allocation12_spill] sm:$0xff] }
  0xba   :  { %v537_v36 = vadd.f32 %v505_v59, %v3992_v9  ;;  %v529_v52 = vadd.f32 %v497_v53, %v3993_v58  ;;  %v3018_v51 = vadd.f32 %v730_v0, %v657_v56  ;;  %v420_v60 = vsel %vm416_vm2, %v405_v38, %v413_v57  ;;  %v3998_v53 = vld [vmem:[#allocation45_spill] sm:$0xff]  ;;  %v3999_v56 = vld [vmem:[#allocation46_spill] sm:$0xff] }
  0xbb   :  { %v3020_v1 = vadd.f32 %v722_v24, %v649_v34  ;;  %v419_v47 = vsel %vm416_vm2, %v403_v61, %v411_v18  ;;  %v521_v14 = vmul.f32 %v481_v10, %v420_v60  ;;  %v731_v0 = vmul.f32 %v691_v16, %v3998_v53  ;;  %v4000_v38 = vld [vmem:[#allocation90_spill] sm:$0xff]  ;;  %v4001_v9 = vld [vmem:[#allocation93_spill] sm:$0xff] }
  0xbc   :  { %3994 = vst [vmem:[#allocation30_spill] sm:$0xff] %v3018_v51  ;;  %v642_v45 = vadd.f32 %v3996_v30, %v537_v36  ;;  %v634_v63 = vadd.f32 %v3997_v55, %v529_v52  ;;  %v513_v59 = vmul.f32 %v481_v10, %v419_v47  ;;  %1225 = vrot.lane.b32.xlu1 %v3010_v22, %s1620_s16  ;;  %v767_v58 = vpop.permute.xlu1 %766  ;;  %v4004_v10 = vld [vmem:[#allocation13_spill] sm:$0xff]  ;;  %v4005_v60 = vld [vmem:[#allocation14_spill] sm:$0xff]  ;;  %v4006_v30 = vld [vmem:[#allocation96_spill] sm:$0xff] }
  0xbd   :  { %3995 = vst [vmem:[#allocation59_spill] sm:$0xff] %v3020_v1  ;;  %v723_v24 = vmul.f32 %v691_v16, %v3999_v56  ;;  %1223 = vrot.lane.b32.xlu0 %v3014_v21, %s1620_s16  ;;  %v553_v34 = vadd.f32 %v521_v14, %v4000_v38  ;;  %v765_v36 = vpop.permute.xlu0 %764  ;;  %v4007_v16 = vld [vmem:[#allocation97_spill] sm:$0xff]  ;;  %v3049_v14 = vld [vmem:[%s3647_s1 + $0x24] sm:$0xff]  ;;  %v4016_v51 = vld [vmem:[#allocation4_spill] sm:$0xff] }
  0xbe   :  { %v545_v61 = vadd.f32 %v513_v59, %v4001_v9  ;;  %v3036_v57 = vadd.f32 %v715_v40, %v642_v45  ;;  %v3038_v52 = vadd.f32 %v707_v50, %v634_v63  ;;  %v3058_v63 = vld [vmem:[%s3647_s1 + $0x36] sm:$0xff]  ;;  %v4010_v59 = vld [vmem:[#allocation98_spill] sm:$0xff]  ;;  %v4011_v38 = vld [vmem:[#allocation3_spill] sm:$0xff] }
  0xbf   :  { %v658_v18 = vadd.f32 %v4004_v10, %v553_v34  ;;  %v872_v34 = vrot.slane %v3049_v14, %v4011_v38  ;;  %v4012_v9 = vld [vmem:[#allocation102_spill] sm:$0xff] }
  0xc0   :  { %4002 = vst [vmem:[#allocation60_spill] sm:$0xff] %v3036_v57  ;;  %4003 = vst [vmem:[#allocation2_spill] sm:$0xff] %v3038_v52  ;;  %v650_v47 = vadd.f32 %v4005_v60, %v545_v61  ;;  %1229 = vrot.lane.b32.xlu1 %v4006_v30, %s1620_s16  ;;  %v771_v55 = vpop.permute.xlu1 %770  ;;  %v4015_v57 = vld [vmem:[#allocation6_spill] sm:$0xff] }
  0xc1   :  { %1227 = vrot.lane.b32.xlu0 %v4007_v16, %s1620_s16  ;;  %v769_v40 = vpop.permute.xlu0 %768  ;;  %v3051_v45 = vadd.f32 %v731_v0, %v658_v18  ;;  %v1082_v0 = vrot.slane %v3058_v63, %v4011_v38 }
  0xc2   :  { %v3053_v50 = vadd.f32 %v723_v24, %v650_v47 }
  0xc3   :  { %4008 = vst [vmem:[#allocation34_spill] sm:$0xff] %v3051_v45  ;;  %v4014_v45 = vld [vmem:[#allocation104_spill] sm:$0xff]  ;;  %v1127_v52 = vmul.f32 %v1082_v0, %v2191_v7  ;;  %v1119_v38 = vmul.f32 %v1082_v0, %v2195_v39  ;;  %v1143_v53 = vmul.f32 %v1082_v0, %v2206_v25  ;;  %v1135_v5 = vmul.f32 %v1082_v0, %v2210_v41 }
  0xc4   :  { %4009 = vst [vmem:[#allocation35_spill] sm:$0xff] %v3053_v50  ;;  %1233 = vrot.lane.b32.xlu1 %v4010_v59, %s1620_s16  ;;  %v775_v61 = vpop.permute.xlu1 %774  ;;  %v4013_v50 = vld [vmem:[#allocation103_spill] sm:$0xff]  ;;  %v4020_v59 = vld [vmem:[#allocation40_spill] sm:$0xff] }
  0xc5   :  { %1231 = vrot.lane.b32.xlu0 %v4012_v9, %s1620_s16  ;;  %v773_v24 = vpop.permute.xlu0 %772  ;;  %v865_v10 = vsel %vm416_vm2, %v767_v58, %v775_v61 }
  0xc6   :  { %v864_v18 = vsel %vm416_vm2, %v765_v36, %v773_v24  ;;  %v917_v60 = vmul.f32 %v872_v34, %v865_v10  ;;  %v3083_v36 = vld [vmem:[%s3647_s1 + $0x2d] sm:$0xff]  ;;  %v4017_v10 = vld [vmem:[#allocation10_spill] sm:$0xff] }
  0xc7   :  { %v909_v47 = vmul.f32 %v872_v34, %v864_v18  ;;  %v981_v18 = vrot.slane %v3083_v36, %v4017_v10  ;;  %v876_v7 = vrot.slane %v3049_v14, %v4017_v10 }
  0xc8   :  { %1237 = vrot.lane.b32.xlu1 %v4013_v50, %s1620_s16  ;;  %v949_v1 = vadd.f32 %v917_v60, %v4015_v57  ;;  %v779_v58 = vpop.permute.xlu1 %778  ;;  %v4019_v60 = vld [vmem:[#allocation22_spill] sm:$0xff] }
  0xc9   :  { %1235 = vrot.lane.b32.xlu0 %v4014_v45, %s1620_s16  ;;  %v941_v56 = vadd.f32 %v909_v47, %v4016_v51  ;;  %v777_v9 = vpop.permute.xlu0 %776  ;;  %v867_v45 = vsel %vm416_vm2, %v771_v55, %v779_v58  ;;  %v4018_v51 = vld [vmem:[#allocation21_spill] sm:$0xff]  ;;  %v1086_v55 = vrot.slane %v3058_v63, %v4017_v10 }
  0xca   :  { %v866_v39 = vsel %vm416_vm2, %v769_v40, %v777_v9  ;;  %v1054_v57 = vadd.f32 %v4018_v51, %v949_v1  ;;  %v933_v50 = vmul.f32 %v872_v34, %v867_v45  ;;  %v4021_v40 = vld [vmem:[#allocation106_spill] sm:$0xff]  ;;  %v4022_v1 = vld [vmem:[#allocation17_spill] sm:$0xff] }
  0xcb   :  { %v1046_v47 = vadd.f32 %v4019_v60, %v941_v56  ;;  %v925_v43 = vmul.f32 %v872_v34, %v866_v39  ;;  %v4025_v60 = vld [vmem:[#allocation80_spill] sm:$0xff] }
  0xcc   :  { %1241 = vrot.lane.b32.xlu1 %v4020_v59, %s1620_s16  ;;  %v965_v32 = vadd.f32 %v933_v50, %v2697_v13  ;;  %v783_v56 = vpop.permute.xlu1 %782  ;;  %v3105_v34 = vadd.f32 %v1127_v52, %v1054_v57  ;;  %v1023_v25 = vmul.f32 %v981_v18, %v4025_v60  ;;  %v4026_v59 = vld [vmem:[#allocation74_spill] sm:$0xff]  ;;  %v4029_v52 = vld [vmem:[#allocation107_spill] sm:$0xff]  ;;  %v1128_v60 = vmul.f32 %v1086_v55, %v3924_v35 }
  0xcd   :  { %1239 = vrot.lane.b32.xlu0 %v4021_v40, %s1620_s16  ;;  %v957_v51 = vadd.f32 %v925_v43, %v4022_v1  ;;  %v781_v45 = vpop.permute.xlu0 %780  ;;  %v3107_v39 = vadd.f32 %v1119_v38, %v1046_v47  ;;  %v1015_v41 = vmul.f32 %v981_v18, %v4026_v59  ;;  %v861_v0 = vsel %vm416_vm2, %v775_v61, %v783_v56  ;;  %v4027_v40 = vld [vmem:[#allocation24_spill] sm:$0xff]  ;;  %v4028_v50 = vld [vmem:[#allocation26_spill] sm:$0xff]  ;;  %v4031_v47 = vld [vmem:[#allocation115_spill] sm:$0xff] }
  0xce   :  { %4023 = vst [vmem:[#allocation33_spill] sm:$0xff] %v3105_v34  ;;  %v860_v10 = vsel %vm416_vm2, %v773_v24, %v781_v45  ;;  %v1070_v13 = vadd.f32 %v4027_v40, %v965_v32  ;;  %v918_v1 = vmul.f32 %v876_v7, %v861_v0  ;;  %v4030_v38 = vld [vmem:[#allocation86_spill] sm:$0xff]  ;;  %v985_v59 = vrot.slane %v3083_v36, %v4031_v47  ;;  %v4032_v24 = vld [vmem:[#allocation108_spill] sm:$0xff] }
  0xcf   :  { %4024 = vst [vmem:[#allocation62_spill] sm:$0xff] %v3107_v39  ;;  %v1062_v43 = vadd.f32 %v4028_v50, %v957_v51  ;;  %v910_v16 = vmul.f32 %v876_v7, %v860_v10  ;;  %v1039_v57 = vmul.f32 %v981_v18, %v4030_v38  ;;  %v1120_v61 = vmul.f32 %v1086_v55, %v3925_v6  ;;  %v4033_v38 = vld [vmem:[#allocation84_spill] sm:$0xff] }
  0xd0   :  { %1245 = vrot.lane.b32.xlu1 %v4029_v52, %s1620_s16  ;;  %v950_v32 = vadd.f32 %v918_v1, %v2723_v42  ;;  %v787_v10 = vpop.permute.xlu1 %786  ;;  %v3128_v0 = vadd.f32 %v1143_v53, %v1070_v13  ;;  %v1031_v39 = vmul.f32 %v981_v18, %v4033_v38  ;;  %v880_v35 = vrot.slane %v3049_v14, %v4031_v47  ;;  %v4034_v53 = vld [vmem:[#allocation109_spill] sm:$0xff]  ;;  %v4035_v13 = vld [vmem:[#allocation112_spill] sm:$0xff] }
  0xd1   :  { %1243 = vrot.lane.b32.xlu0 %v4032_v24, %s1620_s16  ;;  %v942_v40 = vadd.f32 %v910_v16, %v2726_v20  ;;  %v785_v51 = vpop.permute.xlu0 %784  ;;  %v3130_v50 = vadd.f32 %v1135_v5, %v1062_v43  ;;  %v863_v34 = vsel %vm416_vm2, %v779_v58, %v787_v10  ;;  %v1144_v5 = vmul.f32 %v1086_v55, %v3933_v49  ;;  %v4038_v43 = vld [vmem:[#allocation91_spill] sm:$0xff] }
  0xd2   :  { %v862_v6 = vsel %vm416_vm2, %v777_v9, %v785_v51  ;;  %v1055_v42 = vadd.f32 %v1023_v25, %v950_v32  ;;  %v934_v20 = vmul.f32 %v876_v7, %v863_v34  ;;  %v1136_v18 = vmul.f32 %v1086_v55, %v3934_v44 }
  0xd3   :  { %v1047_v1 = vadd.f32 %v1015_v41, %v942_v40  ;;  %v926_v16 = vmul.f32 %v876_v7, %v862_v6  ;;  %v1090_v58 = vrot.slane %v3058_v63, %v4031_v47  ;;  %v1024_v32 = vmul.f32 %v985_v59, %v4038_v43  ;;  %v4039_v40 = vld [vmem:[#allocation92_spill] sm:$0xff] }
  0xd4   :  { %1249 = vrot.lane.b32.xlu1 %v4034_v53, %s1620_s16  ;;  %v966_v9 = vadd.f32 %v934_v20, %v2744_v19  ;;  %v791_v41 = vpop.permute.xlu1 %790  ;;  %v3149_v6 = vadd.f32 %v1128_v60, %v1055_v42  ;;  %v1016_v55 = vmul.f32 %v985_v59, %v4039_v40  ;;  %v4041_v60 = vld [vmem:[#allocation95_spill] sm:$0xff]  ;;  %v4042_v42 = vld [vmem:[#allocation94_spill] sm:$0xff] }
  0xd5   :  { %1247 = vrot.lane.b32.xlu0 %v4035_v13, %s1620_s16  ;;  %v958_v25 = vadd.f32 %v926_v16, %v2747_v46  ;;  %v789_v34 = vpop.permute.xlu0 %788  ;;  %v3151_v7 = vadd.f32 %v1120_v61, %v1047_v1  ;;  %v857_v38 = vsel %vm416_vm2, %v783_v56, %v791_v41  ;;  %v4040_v16 = vld [vmem:[#allocation113_spill] sm:$0xff]  ;;  %v1040_v61 = vmul.f32 %v985_v59, %v4041_v60  ;;  %v4043_v56 = vld [vmem:[#allocation114_spill] sm:$0xff] }
  0xd6   :  { %4036 = vst [vmem:[#allocation63_spill] sm:$0xff] %v3149_v6  ;;  %v856_v13 = vsel %vm416_vm2, %v781_v45, %v789_v34  ;;  %v1071_v53 = vadd.f32 %v1039_v57, %v966_v9  ;;  %v919_v20 = vmul.f32 %v880_v35, %v857_v38  ;;  %v1032_v1 = vmul.f32 %v985_v59, %v4042_v42  ;;  %v4045_v57 = vld [vmem:[#allocation36_spill] sm:$0xff]  ;;  %v4048_v60 = vld [vmem:[#allocation9_spill] sm:$0xff] }
  0xd7   :  { %4037 = vst [vmem:[#allocation57_spill] sm:$0xff] %v3151_v7  ;;  %v1063_v19 = vadd.f32 %v1031_v39, %v958_v25  ;;  %v911_v46 = vmul.f32 %v880_v35, %v856_v13  ;;  %v1129_v43 = vmul.f32 %v1090_v58, %v3941_v33  ;;  %v1121_v40 = vmul.f32 %v1090_v58, %v2840_v26  ;;  %v4044_v7 = vld [vmem:[#allocation15_spill] sm:$0xff] }
  0xd8   :  { %1253 = vrot.lane.b32.xlu1 %v4040_v16, %s1620_s16  ;;  %v951_v45 = vadd.f32 %v919_v20, %v4044_v7  ;;  %v795_v9 = vpop.permute.xlu1 %794  ;;  %v3169_v25 = vadd.f32 %v1144_v5, %v1071_v53  ;;  %v989_v59 = vrot.slane %v3083_v36, %v4048_v60  ;;  %v884_v7 = vrot.slane %v3049_v14, %v4048_v60 }
  0xd9   :  { %1251 = vrot.lane.b32.xlu0 %v4043_v56, %s1620_s16  ;;  %v943_v39 = vadd.f32 %v911_v46, %v4045_v57  ;;  %v793_v13 = vpop.permute.xlu0 %792  ;;  %v3171_v38 = vadd.f32 %v1136_v18, %v1063_v19  ;;  %v859_v42 = vsel %vm416_vm2, %v787_v10, %v795_v9  ;;  %v1145_v53 = vmul.f32 %v1090_v58, %v3948_v11  ;;  %v4049_v19 = vld [vmem:[#allocation38_spill] sm:$0xff]  ;;  %v4050_v10 = vld [vmem:[#allocation43_spill] sm:$0xff] }
  0xda   :  { %4046 = vst [vmem:[#allocation58_spill] sm:$0xff] %v3169_v25  ;;  %v858_v16 = vsel %vm416_vm2, %v785_v51, %v793_v13  ;;  %v1056_v20 = vadd.f32 %v1024_v32, %v951_v45  ;;  %v935_v57 = vmul.f32 %v880_v35, %v859_v42  ;;  %v1137_v5 = vmul.f32 %v1090_v58, %v2869_v12  ;;  %v4053_v32 = vld [vmem:[#allocation99_spill] sm:$0xff] }
  0xdb   :  { %4047 = vst [vmem:[#allocation67_spill] sm:$0xff] %v3171_v38  ;;  %v1048_v46 = vadd.f32 %v1016_v55, %v943_v39  ;;  %v927_v56 = vmul.f32 %v880_v35, %v858_v16  ;;  %v1094_v18 = vrot.slane %v3058_v63, %v4048_v60  ;;  %v1025_v55 = vmul.f32 %v989_v59, %v4053_v32  ;;  %v4054_v35 = vld [vmem:[#allocation100_spill] sm:$0xff] }
  0xdc   :  { %v967_v38 = vadd.f32 %v935_v57, %v4049_v19  ;;  %v799_v47 = vpop.permute.xlu1 %798  ;;  %v3187_v6 = vadd.f32 %v1129_v43, %v1056_v20  ;;  %v1017_v16 = vmul.f32 %v989_v59, %v4054_v35  ;;  %v4055_v19 = vld [vmem:[#allocation105_spill] sm:$0xff]  ;;  %v4057_v32 = vld [vmem:[#allocation44_spill] sm:$0xff] }
  0xdd   :  { %v959_v25 = vadd.f32 %v927_v56, %v4050_v10  ;;  %v797_v51 = vpop.permute.xlu0 %796  ;;  %v3189_v26 = vadd.f32 %v1121_v40, %v1048_v46  ;;  %v853_v58 = vsel %vm416_vm2, %v791_v41, %v799_v47  ;;  %v1033_v10 = vmul.f32 %v989_v59, %v4055_v19  ;;  %v4056_v43 = vld [vmem:[#allocation53_spill] sm:$0xff] }
  0xde   :  { %4051 = vst [vmem:[#allocation110_spill] sm:$0xff] %v3187_v6  ;;  %v852_v45 = vsel %vm416_vm2, %v789_v34, %v797_v51  ;;  %v1072_v39 = vadd.f32 %v1040_v61, %v967_v38  ;;  %v920_v57 = vmul.f32 %v884_v7, %v853_v58  ;;  %v993_v40 = vrot.slane %v3083_v36, %v4056_v43 }
  0xdf   :  { %4052 = vst [vmem:[#allocation111_spill] sm:$0xff] %v3189_v26  ;;  %v1064_v42 = vadd.f32 %v1032_v1, %v959_v25  ;;  %v912_v56 = vmul.f32 %v884_v7, %v852_v45  ;;  %v1130_v20 = vmul.f32 %v1094_v18, %v3957_v15  ;;  %v1122_v46 = vmul.f32 %v1094_v18, %v2896_v4  ;;  %v4058_v26 = vld [vmem:[#allocation18_spill] sm:$0xff] }
  0xe0   :  { %v952_v35 = vadd.f32 %v920_v57, %v4057_v32  ;;  %v803_v60 = vpop.permute.xlu1 %802  ;;  %v3204_v34 = vadd.f32 %v1145_v53, %v1072_v39  ;;  %v1041_v1 = vmul.f32 %v989_v59, %v3940_v27  ;;  %v888_v58 = vrot.slane %v3049_v14, %v4056_v43 }
  0xe1   :  { %v944_v41 = vadd.f32 %v912_v56, %v4058_v26  ;;  %v801_v6 = vpop.permute.xlu0 %800  ;;  %v3206_v61 = vadd.f32 %v1137_v5, %v1064_v42  ;;  %v855_v25 = vsel %vm416_vm2, %v795_v9, %v803_v60  ;;  %v1146_v53 = vmul.f32 %v1094_v18, %v3969_v23 }
  0xe2   :  { %v854_v38 = vsel %vm416_vm2, %v793_v13, %v801_v6  ;;  %v1057_v45 = vadd.f32 %v1025_v55, %v952_v35  ;;  %v936_v26 = vmul.f32 %v884_v7, %v855_v25  ;;  %v1138_v5 = vmul.f32 %v1094_v18, %v2928_v29 }
  0xe3   :  { %v1049_v57 = vadd.f32 %v1017_v16, %v944_v41  ;;  %v928_v56 = vmul.f32 %v884_v7, %v854_v38  ;;  %v1098_v27 = vrot.slane %v3058_v63, %v4056_v43  ;;  %v1026_v55 = vmul.f32 %v993_v40, %v3949_v62 }
  0xe4   :  { %v968_v59 = vadd.f32 %v936_v26, %v2844_v31  ;;  %v807_v39 = vpop.permute.xlu1 %806  ;;  %v3221_v42 = vadd.f32 %v1130_v20, %v1057_v45  ;;  %v1018_v7 = vmul.f32 %v993_v40, %v3950_v3  ;;  %v1042_v41 = vmul.f32 %v993_v40, %v3958_v2  ;;  %v4059_v20 = vld [vmem:[#allocation61_spill] sm:$0xff]  ;;  %v4060_v3 = vld [vmem:[#allocation47_spill] sm:$0xff]  ;;  %v4061_v45 = vld [vmem:[#allocation48_spill] sm:$0xff] }
  0xe5   :  { %v960_v9 = vadd.f32 %v928_v56, %v2847_v28  ;;  %v805_v13 = vpop.permute.xlu0 %804  ;;  %v3223_v19 = vadd.f32 %v1122_v46, %v1049_v57  ;;  %v849_v18 = vsel %vm416_vm2, %v799_v47, %v807_v39  ;;  %v997_v46 = vrot.slane %v3083_v36, %v4059_v20 }
  0xe6   :  { %v848_v16 = vsel %vm416_vm2, %v797_v51, %v805_v13  ;;  %v1073_v32 = vadd.f32 %v1041_v1, %v968_v59  ;;  %v921_v35 = vmul.f32 %v888_v58, %v849_v18  ;;  %v1131_v25 = vmul.f32 %v1098_v27, %v3980_v17  ;;  %v4064_v1 = vld [vmem:[#allocation28_spill] sm:$0xff] }
  0xe7   :  { %v1065_v31 = vadd.f32 %v1033_v10, %v960_v9  ;;  %v913_v28 = vmul.f32 %v888_v58, %v848_v16  ;;  %v1123_v62 = vmul.f32 %v1098_v27, %v2955_v54  ;;  %v1034_v56 = vmul.f32 %v993_v40, %v4064_v1 }
  0xe8   :  { %v953_v38 = vadd.f32 %v921_v35, %v4060_v3  ;;  %v811_v57 = vpop.permute.xlu1 %810  ;;  %v3238_v51 = vadd.f32 %v1146_v53, %v1073_v32  ;;  %v892_v9 = vrot.slane %v3049_v14, %v4059_v20  ;;  %v1147_v53 = vmul.f32 %v1098_v27, %v3989_v37  ;;  %v4065_v32 = vld [vmem:[#allocation20_spill] sm:$0xff] }
  0xe9   :  { %v945_v47 = vadd.f32 %v913_v28, %v4061_v45  ;;  %v809_v26 = vpop.permute.xlu0 %808  ;;  %v3240_v10 = vadd.f32 %v1138_v5, %v1065_v31  ;;  %v851_v2 = vsel %vm416_vm2, %v803_v60, %v811_v57  ;;  %v1139_v5 = vmul.f32 %v1098_v27, %v2981_v8  ;;  %v4066_v60 = vld [vmem:[#allocation19_spill] sm:$0xff] }
  0xea   :  { %4062 = vst [vmem:[#allocation64_spill] sm:$0xff] %v3238_v51  ;;  %v850_v59 = vsel %vm416_vm2, %v801_v6, %v809_v26  ;;  %v1058_v18 = vadd.f32 %v1026_v55, %v953_v38  ;;  %v937_v35 = vmul.f32 %v888_v58, %v851_v2  ;;  %v1102_v40 = vrot.slane %v3058_v63, %v4059_v20  ;;  %v4069_v55 = vld [vmem:[#allocation31_spill] sm:$0xff] }
  0xeb   :  { %4063 = vst [vmem:[#allocation66_spill] sm:$0xff] %v3240_v10  ;;  %v1050_v16 = vadd.f32 %v1018_v7, %v945_v47  ;;  %v929_v28 = vmul.f32 %v888_v58, %v850_v59  ;;  %v1027_v7 = vmul.f32 %v997_v46, %v4069_v55  ;;  %v4070_v58 = vld [vmem:[#allocation32_spill] sm:$0xff]  ;;  %v4073_v55 = vld [vmem:[#allocation23_spill] sm:$0xff] }
  0xec   :  { %v969_v31 = vadd.f32 %v937_v35, %v4065_v32  ;;  %v815_v45 = vpop.permute.xlu1 %814  ;;  %v3255_v1 = vadd.f32 %v1131_v25, %v1058_v18  ;;  %v1019_v38 = vmul.f32 %v997_v46, %v4070_v58  ;;  %v4071_v32 = vld [vmem:[#allocation37_spill] sm:$0xff]  ;;  %v4072_v25 = vld [vmem:[#allocation39_spill] sm:$0xff] }
  0xed   :  { %v961_v3 = vadd.f32 %v929_v28, %v4066_v60  ;;  %v813_v6 = vpop.permute.xlu0 %812  ;;  %v3257_v10 = vadd.f32 %v1123_v62, %v1050_v16  ;;  %v845_v27 = vsel %vm416_vm2, %v807_v39, %v815_v45  ;;  %v1043_v60 = vmul.f32 %v997_v46, %v4071_v32 }
  0xee   :  { %4067 = vst [vmem:[#allocation72_spill] sm:$0xff] %v3255_v1  ;;  %v844_v47 = vsel %vm416_vm2, %v805_v13, %v813_v6  ;;  %v1074_v2 = vadd.f32 %v1042_v41, %v969_v31  ;;  %v922_v35 = vmul.f32 %v892_v9, %v845_v27  ;;  %v1035_v18 = vmul.f32 %v997_v46, %v4072_v25  ;;  %v4076_v41 = vld [vmem:[#allocation65_spill] sm:$0xff] }
  0xef   :  { %4068 = vst [vmem:[#allocation27_spill] sm:$0xff] %v3257_v10  ;;  %v1066_v59 = vadd.f32 %v1034_v56, %v961_v3  ;;  %v914_v28 = vmul.f32 %v892_v9, %v844_v47  ;;  %v1132_v62 = vmul.f32 %v1102_v40, %v3010_v22  ;;  %v1124_v16 = vmul.f32 %v1102_v40, %v3014_v21  ;;  %v4074_v10 = vld [vmem:[#allocation25_spill] sm:$0xff] }
  0xf0   :  { %v954_v58 = vadd.f32 %v922_v35, %v4073_v55  ;;  %v819_v39 = vpop.permute.xlu1 %818  ;;  %v3271_v51 = vadd.f32 %v1147_v53, %v1074_v2  ;;  %v1001_v56 = vrot.slane %v3083_v36, %v4076_v41  ;;  %v896_v3 = vrot.slane %v3049_v14, %v4076_v41 }
  0xf1   :  { %v946_v20 = vadd.f32 %v914_v28, %v4074_v10  ;;  %v817_v1 = vpop.permute.xlu0 %816  ;;  %v3273_v13 = vadd.f32 %v1139_v5, %v1066_v59  ;;  %v847_v46 = vsel %vm416_vm2, %v811_v57, %v819_v39  ;;  %v1148_v53 = vmul.f32 %v1102_v40, %v4006_v30  ;;  %v4077_v5 = vld [vmem:[#allocation97_spill] sm:$0xff]  ;;  %v4078_v28 = vld [vmem:[#allocation7_spill] sm:$0xff] }
  0xf2   :  { %v846_v31 = vsel %vm416_vm2, %v809_v26, %v817_v1  ;;  %v1059_v27 = vadd.f32 %v1027_v7, %v954_v58  ;;  %v938_v47 = vmul.f32 %v892_v9, %v847_v46  ;;  %v1140_v2 = vmul.f32 %v1102_v40, %v4077_v5  ;;  %v4079_v57 = vld [vmem:[#allocation5_spill] sm:$0xff] }
  0xf3   :  { %4075 = vst [vmem:[#allocation68_spill] sm:$0xff] %v3273_v13  ;;  %v1051_v10 = vadd.f32 %v1019_v38, %v946_v20  ;;  %v930_v35 = vmul.f32 %v892_v9, %v846_v31  ;;  %v1106_v59 = vrot.slane %v3058_v63, %v4076_v41  ;;  %v4082_v7 = vld [vmem:[#allocation41_spill] sm:$0xff] }
  0xf4   :  { %v970_v32 = vadd.f32 %v938_v47, %v4078_v28  ;;  %v823_v55 = vpop.permute.xlu1 %822  ;;  %v3289_v26 = vadd.f32 %v1132_v62, %v1059_v27  ;;  %v1028_v20 = vmul.f32 %v1001_v56, %v4082_v7  ;;  %v4083_v47 = vld [vmem:[#allocation42_spill] sm:$0xff] }
  0xf5   :  { %v962_v25 = vadd.f32 %v930_v35, %v4079_v57  ;;  %v3291_v13 = vadd.f32 %v1124_v16, %v1051_v10  ;;  %v841_v9 = vsel %vm416_vm2, %v815_v45, %v823_v55  ;;  %v821_v38 = vpop.permute.xlu0 %820  ;;  %v1020_v28 = vmul.f32 %v1001_v56, %v4083_v47  ;;  %v4084_v35 = vld [vmem:[#allocation45_spill] sm:$0xff]  ;;  %v4085_v27 = vld [vmem:[#allocation98_spill] sm:$0xff] }
  0xf6   :  { %4080 = vst [vmem:[#allocation70_spill] sm:$0xff] %v3289_v26  ;;  %v1075_v58 = vadd.f32 %v1043_v60, %v970_v32  ;;  %v923_v46 = vmul.f32 %v896_v3, %v841_v9  ;;  %v840_v31 = vsel %vm416_vm2, %v813_v6, %v821_v38  ;;  %v1044_v57 = vmul.f32 %v1001_v56, %v4084_v35  ;;  %v4086_v10 = vld [vmem:[#allocation29_spill] sm:$0xff]  ;;  %v4089_v60 = vld [vmem:[#allocation8_spill] sm:$0xff]  ;;  %v4090_v32 = vld [vmem:[#allocation102_spill] sm:$0xff] }
  0xf7   :  { %4081 = vst [vmem:[#allocation69_spill] sm:$0xff] %v3291_v13  ;;  %v1067_v40 = vadd.f32 %v1035_v18, %v962_v25  ;;  %v915_v62 = vmul.f32 %v896_v3, %v840_v31  ;;  %v1133_v16 = vmul.f32 %v1106_v59, %v4085_v27  ;;  %v1005_v18 = vrot.slane %v3083_v36, %v4089_v60  ;;  %v4091_v6 = vld [vmem:[#allocation56_spill] sm:$0xff] }
  0xf8   :  { %v955_v13 = vadd.f32 %v923_v46, %v4086_v10  ;;  %v827_v7 = vpop.permute.xlu1 %826  ;;  %v3302_v41 = vadd.f32 %v1148_v53, %v1075_v58  ;;  %v1125_v25 = vmul.f32 %v1106_v59, %v4090_v32  ;;  %v900_v53 = vrot.slane %v3049_v14, %v4089_v60  ;;  %v4093_v10 = vld [vmem:[#allocation103_spill] sm:$0xff] }
  0xf9   :  { %v3304_v45 = vadd.f32 %v1140_v2, %v1067_v40  ;;  %v947_v9 = vadd.f32 %v915_v62, %v4091_v6  ;;  %v843_v47 = vsel %vm416_vm2, %v819_v39, %v827_v7  ;;  %v825_v31 = vpop.permute.xlu0 %824  ;;  %v4092_v2 = vld [vmem:[#allocation46_spill] sm:$0xff]  ;;  %v1110_v62 = vrot.slane %v3058_v63, %v4089_v60 }
  0xfa   :  { %4087 = vst [vmem:[#allocation71_spill] sm:$0xff] %v3302_v41  ;;  %v1060_v35 = vadd.f32 %v1028_v20, %v955_v13  ;;  %v939_v26 = vmul.f32 %v896_v3, %v843_v47  ;;  %v842_v46 = vsel %vm416_vm2, %v817_v1, %v825_v31  ;;  %v1036_v58 = vmul.f32 %v1001_v56, %v4092_v2  ;;  %v4094_v6 = vld [vmem:[#allocation30_spill] sm:$0xff]  ;;  %v4096_v20 = vld [vmem:[#allocation104_spill] sm:$0xff]  ;;  %v4097_v1 = vld [vmem:[#allocation59_spill] sm:$0xff] }
  0xfb   :  { %4088 = vst [vmem:[#allocation78_spill] sm:$0xff] %v3304_v45  ;;  %v1052_v40 = vadd.f32 %v1020_v28, %v947_v9  ;;  %v931_v36 = vmul.f32 %v896_v3, %v842_v46  ;;  %v1149_v45 = vmul.f32 %v1106_v59, %v4093_v10  ;;  %v1141_v47 = vmul.f32 %v1106_v59, %v4096_v20  ;;  %v4098_v3 = vld [vmem:[#allocation49_spill] sm:$0xff]  ;;  %v4100_v59 = vld [vmem:[#allocation40_spill] sm:$0xff] }
  0xfc   :  { %v971_v39 = vadd.f32 %v939_v26, %v4094_v6  ;;  %v831_v41 = vpop.permute.xlu1 %830  ;;  %v3321_v13 = vadd.f32 %v1133_v16, %v1060_v35  ;;  %v1029_v9 = vmul.f32 %v1005_v18, %v4098_v3  ;;  %v4099_v26 = vld [vmem:[#allocation50_spill] sm:$0xff] }
  0xfd   :  { %v963_v32 = vadd.f32 %v931_v36, %v4097_v1  ;;  %v837_v14 = vsel %vm416_vm2, %v823_v55, %v831_v41  ;;  %v829_v56 = vpop.permute.xlu0 %828  ;;  %v3327_v28 = vadd.f32 %v1125_v25, %v1052_v40  ;;  %v1021_v16 = vmul.f32 %v1005_v18, %v4099_v26  ;;  %v4101_v36 = vld [vmem:[#allocation60_spill] sm:$0xff]  ;;  %v4103_v55 = vld [vmem:[#allocation106_spill] sm:$0xff] }
  0xfe   :  { %4095 = vst [vmem:[#allocation73_spill] sm:$0xff] %v3321_v13  ;;  %v1076_v46 = vadd.f32 %v1044_v57, %v971_v39  ;;  %v924_v2 = vmul.f32 %v900_v53, %v837_v14  ;;  %v836_v63 = vsel %vm416_vm2, %v821_v38, %v829_v56  ;;  %v1134_v13 = vmul.f32 %v1110_v62, %v4100_v59  ;;  %v4104_v40 = vld [vmem:[#allocation2_spill] sm:$0xff]  ;;  %v4106_v14 = vld [vmem:[#allocation51_spill] sm:$0xff] }
  0xff   :  { %v1068_v35 = vadd.f32 %v1036_v58, %v963_v32  ;;  %v916_v6 = vmul.f32 %v900_v53, %v836_v63  ;;  %v1126_v25 = vmul.f32 %v1110_v62, %v4103_v55  ;;  %v1045_v32 = vmul.f32 %v1005_v18, %v4106_v14  ;;  %v4107_v63 = vld [vmem:[#allocation52_spill] sm:$0xff] }
 0x100   :  { %v956_v1 = vadd.f32 %v924_v2, %v4101_v36  ;;  %v835_v60 = vpop.permute.xlu1 %834  ;;  %v3335_v41 = vadd.f32 %v1149_v45, %v1076_v46  ;;  %v1037_v45 = vmul.f32 %v1005_v18, %v4107_v63  ;;  %v1150_v36 = vmul.f32 %v1110_v62, %v4029_v52  ;;  %v3358_v18 = vld [vmem:[%s3647_s1 + $0x48] sm:$0xff]  ;;  %v4115_v63 = vld [vmem:[#allocation54_spill] sm:$0xff] }
 0x101   :  { %v948_v3 = vadd.f32 %v916_v6, %v4104_v40  ;;  %v839_v57 = vsel %vm416_vm2, %v827_v7, %v835_v60  ;;  %v833_v39 = vpop.permute.xlu0 %832  ;;  %v3341_v38 = vadd.f32 %v1141_v47, %v1068_v35  ;;  %v4108_v6 = vld [vmem:[#allocation34_spill] sm:$0xff]  ;;  %v1142_v60 = vmul.f32 %v1110_v62, %v4032_v24  ;;  %v4110_v47 = vld [vmem:[#allocation35_spill] sm:$0xff] }
 0x102   :  { %4102 = vst [vmem:[#allocation76_spill] sm:$0xff] %v3335_v41  ;;  %v1061_v58 = vadd.f32 %v1029_v9, %v956_v1  ;;  %v940_v56 = vmul.f32 %v900_v53, %v839_v57  ;;  %v838_v2 = vsel %vm416_vm2, %v825_v31, %v833_v39 }
 0x103   :  { %4105 = vst [vmem:[#allocation75_spill] sm:$0xff] %v3341_v38  ;;  %v1053_v46 = vadd.f32 %v1021_v16, %v948_v3  ;;  %v932_v26 = vmul.f32 %v900_v53, %v838_v2  ;;  %v3363_v53 = vld [vmem:[%s3647_s1 + $0x3f] sm:$0xff] }
 0x104   :  { %v972_v40 = vadd.f32 %v940_v56, %v4108_v6  ;;  %v1186_v41 = vpop.permute.xlu1 %1185  ;;  %v3349_v7 = vadd.f32 %v1134_v13, %v1061_v58  ;;  %v3376_v58 = vld [vmem:[%s3648_s2] sm:$0xff] }
 0x105   :  { %v964_v35 = vadd.f32 %v932_v26, %v4110_v47  ;;  %v1184_v9 = vpop.permute.xlu0 %1183  ;;  %v3353_v1 = vadd.f32 %v1126_v25, %v1053_v46  ;;  %v4114_v25 = vld [vmem:[#allocation3_spill] sm:$0xff]  ;;  %v4117_v47 = vld [vmem:[#allocation33_spill] sm:$0xff] }
 0x106   :  { %4109 = vst [vmem:[#allocation77_spill] sm:$0xff] %v3349_v7  ;;  %v1077_v57 = vadd.f32 %v1045_v32, %v972_v40  ;;  %v1396_v39 = vrot.slane %v3358_v18, %v4114_v25  ;;  %v1291_v14 = vrot.slane %v3363_v53, %v4114_v25 }
 0x107   :  { %4111 = vst [vmem:[#allocation85_spill] sm:$0xff] %v3353_v1  ;;  %v1069_v31 = vadd.f32 %v1037_v45, %v964_v35 }
 0x108   :  { %v1190_v13 = vpop.permute.xlu1 %1189  ;;  %v3365_v16 = vadd.f32 %v1150_v36, %v1077_v57  ;;  %v1441_v45 = vmul.f32 %v1396_v39, %v4115_v63  ;;  %v4116_v36 = vld [vmem:[#allocation55_spill] sm:$0xff] }
 0x109   :  { %v1188_v62 = vpop.permute.xlu0 %1187  ;;  %v3367_v3 = vadd.f32 %v1142_v60, %v1069_v31  ;;  %v1433_v6 = vmul.f32 %v1396_v39, %v4116_v36  ;;  %v1502_v60 = vrot.slane %v3376_v58, %v4114_v25  ;;  %v1457_v31 = vmul.f32 %v1396_v39, %v3933_v49 }
 0x10a   :  { %4112 = vst [vmem:[#allocation101_spill] sm:$0xff] %v3365_v16  ;;  %v4119_v16 = vld [vmem:[#allocation62_spill] sm:$0xff] }
 0x10b   :  { %4113 = vst [vmem:[#allocation79_spill] sm:$0xff] %v3367_v3  ;;  %v4118_v3 = vld [vmem:[#allocation10_spill] sm:$0xff] }
 0x10c   :  { %v1194_v32 = vpop.permute.xlu1 %1193  ;;  %v1295_v25 = vrot.slane %v3363_v53, %v4118_v3 }
 0x10d   :  { %v1284_v56 = vsel %vm416_vm2, %v1186_v41, %v1194_v32  ;;  %v1192_v2 = vpop.permute.xlu0 %1191  ;;  %v1400_v41 = vrot.slane %v3358_v18, %v4118_v3 }
 0x10e   :  { %v1336_v46 = vmul.f32 %v1291_v14, %v1284_v56  ;;  %v1283_v26 = vsel %vm416_vm2, %v1184_v9, %v1192_v2 }
 0x10f   :  { %v1328_v40 = vmul.f32 %v1291_v14, %v1283_v26 }
 0x110   :  { %v1368_v35 = vadd.f32 %v1336_v46, %v4117_v47  ;;  %v1449_v46 = vmul.f32 %v1396_v39, %v3934_v44 }
 0x111   :  { %v1198_v57 = vpop.permute.xlu1 %1197  ;;  %v1360_v63 = vadd.f32 %v1328_v40, %v4119_v16  ;;  %v1196_v9 = vpop.permute.xlu0 %1195 }
 0x112   :  { %v1286_v56 = vsel %vm416_vm2, %v1190_v13, %v1198_v57  ;;  %v1473_v1 = vadd.f32 %v1441_v45, %v1368_v35  ;;  %v1285_v26 = vsel %vm416_vm2, %v1188_v62, %v1196_v9  ;;  %v1442_v62 = vmul.f32 %v1400_v41, %v3941_v33 }
 0x113   :  { %v1352_v36 = vmul.f32 %v1291_v14, %v1286_v56  ;;  %v1465_v49 = vadd.f32 %v1433_v6, %v1360_v63  ;;  %v1344_v47 = vmul.f32 %v1291_v14, %v1285_v26  ;;  %v1458_v6 = vmul.f32 %v1400_v41, %v3948_v11  ;;  %v4122_v56 = vld [vmem:[#allocation115_spill] sm:$0xff]  ;;  %v4123_v26 = vld [vmem:[#allocation57_spill] sm:$0xff] }
 0x114   :  { %v1547_v7 = vadd.f32 %v1502_v60, %v1473_v1  ;;  %v1506_v63 = vrot.slane %v3376_v58, %v4118_v3 }
 0x115   :  { %v1384_v38 = vadd.f32 %v1352_v36, %v3128_v0  ;;  %v1202_v16 = vpop.permute.xlu1 %1201  ;;  %v1539_v40 = vadd.f32 %v1502_v60, %v1465_v49  ;;  %v1376_v13 = vadd.f32 %v1344_v47, %v3130_v50  ;;  %v1200_v35 = vpop.permute.xlu0 %1199  ;;  %v4120_v0 = vld [vmem:[#allocation16_spill] sm:$0xff] }
 0x116   :  { %v1280_v45 = vsel %vm416_vm2, %v1194_v32, %v1202_v16  ;;  %1579 = vst [vmem:[%s3649_s3 + $0x40] sm:$0xff] %v1547_v7  ;;  %v1279_v1 = vsel %vm416_vm2, %v1192_v2, %v1200_v35  ;;  %v1434_v14 = vmul.f32 %v1400_v41, %v4120_v0  ;;  %v4121_v7 = vld [vmem:[#allocation63_spill] sm:$0xff]  ;;  %v1404_v2 = vrot.slane %v3358_v18, %v4122_v56 }
 0x117   :  { %v1489_v44 = vadd.f32 %v1457_v31, %v1384_v38  ;;  %v1337_v39 = vmul.f32 %v1295_v25, %v1280_v45  ;;  %1571 = vst [vmem:[%s3649_s3] sm:$0xff] %v1539_v40  ;;  %v1481_v50 = vadd.f32 %v1449_v46, %v1376_v13  ;;  %v1329_v32 = vmul.f32 %v1295_v25, %v1279_v1 }
 0x118   :  { %v1299_v13 = vrot.slane %v3363_v53, %v4122_v56 }
 0x119   :  { %v1563_v33 = vadd.f32 %v1502_v60, %v1489_v44  ;;  %v1369_v38 = vadd.f32 %v1337_v39, %v4121_v7  ;;  %v1555_v36 = vadd.f32 %v1502_v60, %v1481_v50  ;;  %v1361_v49 = vadd.f32 %v1329_v32, %v4123_v26  ;;  %v4124_v39 = vld [vmem:[#allocation58_spill] sm:$0xff]  ;;  %v4125_v50 = vld [vmem:[#allocation67_spill] sm:$0xff] }
 0x11a   :  { %v1206_v31 = vpop.permute.xlu1 %1205  ;;  %v1204_v46 = vpop.permute.xlu0 %1203  ;;  %v1450_v60 = vmul.f32 %v1400_v41, %v2869_v12  ;;  %v1443_v7 = vmul.f32 %v1404_v2, %v3957_v15  ;;  %v1510_v26 = vrot.slane %v3376_v58, %v4122_v56 }
 0x11b   :  { %v1282_v47 = vsel %vm416_vm2, %v1198_v57, %v1206_v31  ;;  %1595 = vst [vmem:[%s3649_s3 + $0xc0] sm:$0xff] %v1563_v33  ;;  %v1474_v11 = vadd.f32 %v1442_v62, %v1369_v38  ;;  %v1281_v3 = vsel %vm416_vm2, %v1196_v9, %v1204_v46  ;;  %1587 = vst [vmem:[%s3649_s3 + $0x80] sm:$0xff] %v1555_v36 }
 0x11c   :  { %v1353_v40 = vmul.f32 %v1295_v25, %v1282_v47  ;;  %v1466_v57 = vadd.f32 %v1434_v14, %v1361_v49  ;;  %v1345_v45 = vmul.f32 %v1295_v25, %v1281_v3  ;;  %v1435_v14 = vmul.f32 %v1404_v2, %v2896_v4  ;;  %v4126_v49 = vld [vmem:[#allocation110_spill] sm:$0xff]  ;;  %v4128_v4 = vld [vmem:[#allocation111_spill] sm:$0xff] }
 0x11d   :  { %v1548_v44 = vadd.f32 %v1506_v63, %v1474_v11  ;;  %v1459_v36 = vmul.f32 %v1404_v2, %v3969_v23  ;;  %v4127_v11 = vld [vmem:[#allocation9_spill] sm:$0xff] }
 0x11e   :  { %v1385_v1 = vadd.f32 %v1353_v40, %v4124_v39  ;;  %v1210_v0 = vpop.permute.xlu1 %1209  ;;  %v1540_v62 = vadd.f32 %v1506_v63, %v1466_v57  ;;  %v1377_v32 = vadd.f32 %v1345_v45, %v4125_v50 }
 0x11f   :  { %v1276_v9 = vsel %vm416_vm2, %v1202_v16, %v1210_v0  ;;  %v1208_v33 = vpop.permute.xlu0 %1207  ;;  %1580 = vst [vmem:[%s3649_s3 + $0x48] sm:$0xff] %v1548_v44  ;;  %v1303_v44 = vrot.slane %v3363_v53, %v4127_v11 }
 0x120   :  { %v1490_v12 = vadd.f32 %v1458_v6, %v1385_v1  ;;  %v1338_v41 = vmul.f32 %v1299_v13, %v1276_v9  ;;  %v1275_v25 = vsel %vm416_vm2, %v1200_v35, %v1208_v33  ;;  %1572 = vst [vmem:[%s3649_s3 + $0x8] sm:$0xff] %v1540_v62  ;;  %v1482_v38 = vadd.f32 %v1450_v60, %v1377_v32 }
 0x121   :  { %v1330_v16 = vmul.f32 %v1299_v13, %v1275_v25  ;;  %v1408_v35 = vrot.slane %v3358_v18, %v4127_v11  ;;  %v1514_v25 = vrot.slane %v3376_v58, %v4127_v11 }
 0x122   :  { %v1564_v15 = vadd.f32 %v1506_v63, %v1490_v12  ;;  %v1370_v6 = vadd.f32 %v1338_v41, %v4126_v49  ;;  %v1214_v47 = vpop.permute.xlu1 %1213  ;;  %v1556_v40 = vadd.f32 %v1506_v63, %v1482_v38  ;;  %v1451_v63 = vmul.f32 %v1404_v2, %v2928_v29 }
 0x123   :  { %v1362_v3 = vadd.f32 %v1330_v16, %v4128_v4  ;;  %v1278_v57 = vsel %vm416_vm2, %v1206_v31, %v1214_v47  ;;  %v1212_v60 = vpop.permute.xlu0 %1211  ;;  %v1444_v12 = vmul.f32 %v1408_v35, %v3980_v17  ;;  %v1460_v41 = vmul.f32 %v1408_v35, %v3989_v37 }
 0x124   :  { %1596 = vst [vmem:[%s3649_s3 + $0xc8] sm:$0xff] %v1564_v15  ;;  %v1475_v23 = vadd.f32 %v1443_v7, %v1370_v6  ;;  %v1354_v45 = vmul.f32 %v1299_v13, %v1278_v57  ;;  %v1277_v56 = vsel %vm416_vm2, %v1204_v46, %v1212_v60  ;;  %1588 = vst [vmem:[%s3649_s3 + $0x88] sm:$0xff] %v1556_v40  ;;  %v4129_v40 = vld [vmem:[#allocation64_spill] sm:$0xff] }
 0x125   :  { %v1467_v31 = vadd.f32 %v1435_v14, %v1362_v3  ;;  %v1346_v39 = vmul.f32 %v1299_v13, %v1277_v56  ;;  %v1307_v6 = vrot.slane %v3363_v53, %v4056_v43 }
 0x126   :  { %v1549_v1 = vadd.f32 %v1510_v26, %v1475_v23  ;;  %v1386_v62 = vadd.f32 %v1354_v45, %v3204_v34  ;;  %v1218_v50 = vpop.permute.xlu1 %1217  ;;  %v1436_v34 = vmul.f32 %v1408_v35, %v2955_v54  ;;  %v4130_v23 = vld [vmem:[#allocation66_spill] sm:$0xff] }
 0x127   :  { %v1541_v32 = vadd.f32 %v1510_v26, %v1467_v31  ;;  %v1378_v9 = vadd.f32 %v1346_v39, %v3206_v61  ;;  %v1272_v46 = vsel %vm416_vm2, %v1210_v0, %v1218_v50  ;;  %v1216_v7 = vpop.permute.xlu0 %1215 }
 0x128   :  { %1581 = vst [vmem:[%s3649_s3 + $0x50] sm:$0xff] %v1549_v1  ;;  %v1491_v29 = vadd.f32 %v1459_v36, %v1386_v62  ;;  %v1339_v2 = vmul.f32 %v1303_v44, %v1272_v46  ;;  %v1271_v13 = vsel %vm416_vm2, %v1208_v33, %v1216_v7  ;;  %v1412_v33 = vrot.slane %v3358_v18, %v4056_v43 }
 0x129   :  { %1573 = vst [vmem:[%s3649_s3 + $0x10] sm:$0xff] %v1541_v32  ;;  %v1483_v61 = vadd.f32 %v1451_v63, %v1378_v9  ;;  %v1331_v0 = vmul.f32 %v1303_v44, %v1271_v13  ;;  %v4131_v32 = vld [vmem:[#allocation72_spill] sm:$0xff] }
 0x12a   :  { %v1565_v17 = vadd.f32 %v1510_v26, %v1491_v29  ;;  %v1371_v14 = vadd.f32 %v1339_v2, %v3221_v42  ;;  %v1222_v38 = vpop.permute.xlu1 %1221  ;;  %v1445_v63 = vmul.f32 %v1412_v33, %v3010_v22  ;;  %v1437_v31 = vmul.f32 %v1412_v33, %v3014_v21  ;;  %v4133_v21 = vld [vmem:[#allocation27_spill] sm:$0xff] }
 0x12b   :  { %v1557_v16 = vadd.f32 %v1510_v26, %v1483_v61  ;;  %v1363_v54 = vadd.f32 %v1331_v0, %v3223_v19  ;;  %v1274_v36 = vsel %vm416_vm2, %v1214_v47, %v1222_v38  ;;  %v1220_v15 = vpop.permute.xlu0 %1219  ;;  %v1452_v26 = vmul.f32 %v1408_v35, %v2981_v8 }
 0x12c   :  { %1597 = vst [vmem:[%s3649_s3 + $0xd0] sm:$0xff] %v1565_v17  ;;  %v1476_v37 = vadd.f32 %v1444_v12, %v1371_v14  ;;  %v1355_v49 = vmul.f32 %v1303_v44, %v1274_v36  ;;  %v1273_v42 = vsel %vm416_vm2, %v1212_v60, %v1220_v15  ;;  %v1461_v62 = vmul.f32 %v1412_v33, %v4006_v30  ;;  %v4132_v12 = vld [vmem:[#allocation61_spill] sm:$0xff]  ;;  %v4134_v36 = vld [vmem:[#allocation68_spill] sm:$0xff] }
 0x12d   :  { %1589 = vst [vmem:[%s3649_s3 + $0x90] sm:$0xff] %v1557_v16  ;;  %v1468_v19 = vadd.f32 %v1436_v34, %v1363_v54  ;;  %v1347_v47 = vmul.f32 %v1303_v44, %v1273_v42  ;;  %v1311_v0 = vrot.slane %v3363_v53, %v4132_v12 }
 0x12e   :  { %v1550_v11 = vadd.f32 %v1514_v25, %v1476_v37  ;;  %v1387_v4 = vadd.f32 %v1355_v49, %v4129_v40  ;;  %v1226_v3 = vpop.permute.xlu1 %1225  ;;  %v1522_v40 = vrot.slane %v3376_v58, %v4132_v12 }
 0x12f   :  { %v1542_v57 = vadd.f32 %v1514_v25, %v1468_v19  ;;  %v1379_v45 = vadd.f32 %v1347_v47, %v4130_v23  ;;  %v1268_v60 = vsel %vm416_vm2, %v1218_v50, %v1226_v3  ;;  %v1224_v56 = vpop.permute.xlu0 %1223  ;;  %v1518_v50 = vrot.slane %v3376_v58, %v4056_v43  ;;  %v4137_v23 = vld [vmem:[#allocation65_spill] sm:$0xff] }
 0x130   :  { %1582 = vst [vmem:[%s3649_s3 + $0x58] sm:$0xff] %v1550_v11  ;;  %v1492_v8 = vadd.f32 %v1460_v41, %v1387_v4  ;;  %v1340_v35 = vmul.f32 %v1307_v6, %v1268_v60  ;;  %v1267_v44 = vsel %vm416_vm2, %v1216_v7, %v1224_v56  ;;  %v1416_v7 = vrot.slane %v3358_v18, %v4132_v12  ;;  %v4136_v4 = vld [vmem:[#allocation70_spill] sm:$0xff] }
 0x131   :  { %1574 = vst [vmem:[%s3649_s3 + $0x18] sm:$0xff] %v1542_v57  ;;  %v1484_v39 = vadd.f32 %v1452_v26, %v1379_v45  ;;  %v1332_v1 = vmul.f32 %v1307_v6, %v1267_v44  ;;  %v1453_v41 = vmul.f32 %v1412_v33, %v4077_v5  ;;  %v1420_v45 = vrot.slane %v3358_v18, %v4137_v23 }
 0x132   :  { %v1566_v22 = vadd.f32 %v1514_v25, %v1492_v8  ;;  %v1372_v9 = vadd.f32 %v1340_v35, %v4131_v32  ;;  %v1230_v46 = vpop.permute.xlu1 %1229  ;;  %v1446_v42 = vmul.f32 %v1416_v7, %v4085_v27  ;;  %v1462_v11 = vmul.f32 %v1416_v7, %v4093_v10  ;;  %v4139_v32 = vld [vmem:[#allocation71_spill] sm:$0xff] }
 0x133   :  { %v1558_v29 = vadd.f32 %v1514_v25, %v1484_v39  ;;  %v1364_v2 = vadd.f32 %v1332_v1, %v4133_v21  ;;  %v1270_v13 = vsel %vm416_vm2, %v1222_v38, %v1230_v46  ;;  %v1228_v34 = vpop.permute.xlu0 %1227  ;;  %v1315_v39 = vrot.slane %v3363_v53, %v4137_v23 }
 0x134   :  { %1598 = vst [vmem:[%s3649_s3 + $0xd8] sm:$0xff] %v1566_v22  ;;  %v1477_v30 = vadd.f32 %v1445_v63, %v1372_v9  ;;  %v1356_v61 = vmul.f32 %v1307_v6, %v1270_v13  ;;  %v1269_v43 = vsel %vm416_vm2, %v1220_v15, %v1228_v34  ;;  %v1454_v1 = vmul.f32 %v1416_v7, %v4096_v20 }
 0x135   :  { %1590 = vst [vmem:[%s3649_s3 + $0x98] sm:$0xff] %v1558_v29  ;;  %v1469_v17 = vadd.f32 %v1437_v31, %v1364_v2  ;;  %v1348_v25 = vmul.f32 %v1307_v6, %v1269_v43  ;;  %v4140_v29 = vld [vmem:[#allocation78_spill] sm:$0xff] }
 0x136   :  { %v1551_v14 = vadd.f32 %v1518_v50, %v1477_v30  ;;  %v1388_v38 = vadd.f32 %v1356_v61, %v3271_v51  ;;  %v1234_v16 = vpop.permute.xlu1 %1233  ;;  %v4135_v51 = vld [vmem:[#allocation102_spill] sm:$0xff]  ;;  %v1439_v61 = vmul.f32 %v1420_v45, %v4103_v55 }
 0x137   :  { %v1543_v54 = vadd.f32 %v1518_v50, %v1469_v17  ;;  %v1380_v37 = vadd.f32 %v1348_v25, %v4134_v36  ;;  %v1264_v15 = vsel %vm416_vm2, %v1226_v3, %v1234_v16  ;;  %v1232_v49 = vpop.permute.xlu0 %1231  ;;  %v1438_v26 = vmul.f32 %v1416_v7, %v4135_v51  ;;  %v4143_v51 = vld [vmem:[#allocation76_spill] sm:$0xff] }
 0x138   :  { %1583 = vst [vmem:[%s3649_s3 + $0x60] sm:$0xff] %v1551_v14  ;;  %v1493_v5 = vadd.f32 %v1461_v62, %v1388_v38  ;;  %v1341_v33 = vmul.f32 %v1311_v0, %v1264_v15  ;;  %v1263_v6 = vsel %vm416_vm2, %v1224_v56, %v1232_v49  ;;  %v4138_v56 = vld [vmem:[#allocation69_spill] sm:$0xff]  ;;  %v1526_v25 = vrot.slane %v3376_v58, %v4137_v23 }
 0x139   :  { %1575 = vst [vmem:[%s3649_s3 + $0x20] sm:$0xff] %v1543_v54  ;;  %v1485_v19 = vadd.f32 %v1453_v41, %v1380_v37  ;;  %v1333_v47 = vmul.f32 %v1311_v0, %v1263_v6  ;;  %v4141_v41 = vld [vmem:[#allocation8_spill] sm:$0xff]  ;;  %v4142_v14 = vld [vmem:[#allocation73_spill] sm:$0xff]  ;;  %v1463_v54 = vmul.f32 %v1420_v45, %v4029_v52  ;;  %v1455_v52 = vmul.f32 %v1420_v45, %v4032_v24 }
 0x13a   :  { %v1567_v27 = vadd.f32 %v1518_v50, %v1493_v5  ;;  %v1373_v3 = vadd.f32 %v1341_v33, %v4136_v4  ;;  %v1238_v57 = vpop.permute.xlu1 %1237  ;;  %v1319_v5 = vrot.slane %v3363_v53, %v4141_v41  ;;  %v4145_v53 = vld [vmem:[#allocation109_spill] sm:$0xff] }
 0x13b   :  { %v1559_v60 = vadd.f32 %v1518_v50, %v1485_v19  ;;  %v1365_v63 = vadd.f32 %v1333_v47, %v4138_v56  ;;  %v1266_v8 = vsel %vm416_vm2, %v1230_v46, %v1238_v57  ;;  %v1236_v35 = vpop.permute.xlu0 %1235 }
 0x13c   :  { %1599 = vst [vmem:[%s3649_s3 + $0xe0] sm:$0xff] %v1567_v27  ;;  %v1478_v10 = vadd.f32 %v1446_v42, %v1373_v3  ;;  %v1357_v44 = vmul.f32 %v1311_v0, %v1266_v8  ;;  %v1265_v31 = vsel %vm416_vm2, %v1228_v34, %v1236_v35  ;;  %v1447_v34 = vmul.f32 %v1420_v45, %v4100_v59  ;;  %v4146_v45 = vld [vmem:[#allocation112_spill] sm:$0xff] }
 0x13d   :  { %1591 = vst [vmem:[%s3649_s3 + $0xa0] sm:$0xff] %v1559_v60  ;;  %v1470_v62 = vadd.f32 %v1438_v26, %v1365_v63  ;;  %v1349_v22 = vmul.f32 %v1311_v0, %v1265_v31  ;;  %v1424_v59 = vrot.slane %v3358_v18, %v4141_v41 }
 0x13e   :  { %v1552_v50 = vadd.f32 %v1522_v40, %v1478_v10  ;;  %v1389_v9 = vadd.f32 %v1357_v44, %v4139_v32  ;;  %v1242_v46 = vpop.permute.xlu1 %1241  ;;  %v4147_v10 = vld [vmem:[#allocation77_spill] sm:$0xff] }
 0x13f   :  { %v1544_v12 = vadd.f32 %v1522_v40, %v1470_v62  ;;  %v1381_v21 = vadd.f32 %v1349_v22, %v4140_v29  ;;  %v1260_v2 = vsel %vm416_vm2, %v1234_v16, %v1242_v46  ;;  %v1240_v13 = vpop.permute.xlu0 %1239  ;;  %v1448_v3 = vmul.f32 %v1424_v59, %v4145_v53  ;;  %v4149_v32 = vld [vmem:[#allocation113_spill] sm:$0xff]  ;;  %v4150_v29 = vld [vmem:[#allocation114_spill] sm:$0xff] }
 0x140   :  { %1584 = vst [vmem:[%s3649_s3 + $0x68] sm:$0xff] %v1552_v50  ;;  %v1494_v20 = vadd.f32 %v1462_v11, %v1389_v9  ;;  %v1342_v7 = vmul.f32 %v1315_v39, %v1260_v2  ;;  %v1259_v30 = vsel %vm416_vm2, %v1232_v49, %v1240_v13  ;;  %v4144_v11 = vld [vmem:[#allocation75_spill] sm:$0xff]  ;;  %v1440_v60 = vmul.f32 %v1424_v59, %v4146_v45 }
 0x141   :  { %1576 = vst [vmem:[%s3649_s3 + $0x28] sm:$0xff] %v1544_v12  ;;  %v1486_v43 = vadd.f32 %v1454_v1, %v1381_v21  ;;  %v1334_v0 = vmul.f32 %v1315_v39, %v1259_v30  ;;  %v4148_v1 = vld [vmem:[#allocation85_spill] sm:$0xff]  ;;  %v1464_v9 = vmul.f32 %v1424_v59, %v4149_v32  ;;  %v1456_v21 = vmul.f32 %v1424_v59, %v4150_v29 }
 0x142   :  { %v1568_v17 = vadd.f32 %v1522_v40, %v1494_v20  ;;  %v1374_v38 = vadd.f32 %v1342_v7, %v4142_v14  ;;  %v1246_v16 = vpop.permute.xlu1 %1245  ;;  %v4151_v20 = vld [vmem:[#allocation101_spill] sm:$0xff] }
 0x143   :  { %v1560_v36 = vadd.f32 %v1522_v40, %v1486_v43  ;;  %v1366_v55 = vadd.f32 %v1334_v0, %v3327_v28  ;;  %v1262_v37 = vsel %vm416_vm2, %v1238_v57, %v1246_v16  ;;  %v1244_v15 = vpop.permute.xlu0 %1243 }
 0x144   :  { %1600 = vst [vmem:[%s3649_s3 + $0xe8] sm:$0xff] %v1568_v17  ;;  %v1479_v18 = vadd.f32 %v1447_v34, %v1374_v38  ;;  %v1358_v49 = vmul.f32 %v1315_v39, %v1262_v37  ;;  %v1261_v42 = vsel %vm416_vm2, %v1236_v35, %v1244_v15  ;;  %v1530_v35 = vrot.slane %v3376_v58, %v4141_v41 }
 0x145   :  { %1592 = vst [vmem:[%s3649_s3 + $0xa8] sm:$0xff] %v1560_v36  ;;  %v1471_v28 = vadd.f32 %v1439_v61, %v1366_v55  ;;  %v1350_v33 = vmul.f32 %v1315_v39, %v1261_v42  ;;  %v4152_v61 = vld [vmem:[#allocation79_spill] sm:$0xff] }
 0x146   :  { %v1553_v6 = vadd.f32 %v1526_v25, %v1479_v18  ;;  %v1390_v26 = vadd.f32 %v1358_v49, %v4143_v51  ;;  %v1250_v19 = vpop.permute.xlu1 %1249 }
 0x147   :  { %v1545_v47 = vadd.f32 %v1526_v25, %v1471_v28  ;;  %v1382_v27 = vadd.f32 %v1350_v33, %v4144_v11  ;;  %v1256_v40 = vsel %vm416_vm2, %v1242_v46, %v1250_v19  ;;  %v1248_v4 = vpop.permute.xlu0 %1247 }
 0x148   :  { %1585 = vst [vmem:[%s3649_s3 + $0x70] sm:$0xff] %v1553_v6  ;;  %v1495_v24 = vadd.f32 %v1463_v54, %v1390_v26  ;;  %v1343_v57 = vmul.f32 %v1319_v5, %v1256_v40  ;;  %v1255_v23 = vsel %vm416_vm2, %v1240_v13, %v1248_v4 }
 0x149   :  { %1577 = vst [vmem:[%s3649_s3 + $0x30] sm:$0xff] %v1545_v47  ;;  %v1487_v56 = vadd.f32 %v1455_v52, %v1382_v27  ;;  %v1335_v63 = vmul.f32 %v1319_v5, %v1255_v23 }
 0x14a   :  { %v1569_v8 = vadd.f32 %v1526_v25, %v1495_v24  ;;  %v1375_v44 = vadd.f32 %v1343_v57, %v4147_v10  ;;  %v1254_v31 = vpop.permute.xlu1 %1253 }
 0x14b   :  { %v1561_v39 = vadd.f32 %v1526_v25, %v1487_v56  ;;  %v1367_v62 = vadd.f32 %v1335_v63, %v4148_v1  ;;  %v1258_v22 = vsel %vm416_vm2, %v1246_v16, %v1254_v31  ;;  %v1252_v50 = vpop.permute.xlu0 %1251 }
 0x14c   :  { %1601 = vst [vmem:[%s3649_s3 + $0xf0] sm:$0xff] %v1569_v8  ;;  %v1480_v46 = vadd.f32 %v1448_v3, %v1375_v44  ;;  %v1359_v12 = vmul.f32 %v1319_v5, %v1258_v22  ;;  %v1257_v58 = vsel %vm416_vm2, %v1244_v15, %v1252_v50 }
 0x14d   :  { %1593 = vst [vmem:[%s3649_s3 + $0xb0] sm:$0xff] %v1561_v39  ;;  %v1472_v2 = vadd.f32 %v1440_v60, %v1367_v62  ;;  %v1351_v13 = vmul.f32 %v1319_v5, %v1257_v58 }
 0x14e   :  { %v1554_v34 = vadd.f32 %v1530_v35, %v1480_v46  ;;  %v1391_v7 = vadd.f32 %v1359_v12, %v4151_v20 }
 0x14f   :  { %v1546_v30 = vadd.f32 %v1530_v35, %v1472_v2  ;;  %v1383_v43 = vadd.f32 %v1351_v13, %v4152_v61 }
 0x150   :  { %1586 = vst [vmem:[%s3649_s3 + $0x78] sm:$0xff] %v1554_v34  ;;  %v1496_v48 = vadd.f32 %v1464_v9, %v1391_v7 }
 0x151   :  { %1578 = vst [vmem:[%s3649_s3 + $0x38] sm:$0xff] %v1546_v30  ;;  %v1488_v0 = vadd.f32 %v1456_v21, %v1383_v43 }
 0x152   :  { %v1570_v41 = vadd.f32 %v1530_v35, %v1496_v48 }
 0x153   :  { %v1562_v59 = vadd.f32 %v1530_v35, %v1488_v0 }
 0x154   :  { %1602 = vst [vmem:[%s3649_s3 + $0xf8] sm:$0xff] %v1570_v41 }
 0x155   :  { %1594 = vst [vmem:[%s3649_s3 + $0xb8] sm:$0xff] %v1562_v59 }

</bundles_post_ra>
